<compile_context>
chip_gen: v6e
topology: v6e:2x2x1
jax: 0.10.0
libtpu: 0.0.40
codegen_flags: <defaults>
</compile_context>

<pallas_src>
import functools

import jax
import jax.numpy as jnp
from jax.experimental import pallas as pl
from jax.experimental.pallas import tpu as pltpu

_LANE = 128


def _round_up(n, m):
    return ((n + m - 1) // m) * m


def _fused_mlp_kernel(*refs):
    """refs = (x, bias_cat, w_hbm*N, out, w_vmem*N, dma_sems)."""
    n_layers = (len(refs) - 4) // 2
    x_ref = refs[0]
    bias_ref = refs[1]
    w_hbm = refs[2:2 + n_layers]
    o_ref = refs[2 + n_layers]
    w_vmem = refs[3 + n_layers:3 + 2 * n_layers]
    sems = refs[-1]

    # Kick off ALL weight DMAs up front; wait on each just before its matmul so
    # later-layer weight streams hide behind earlier-layer compute.
    copies = []
    for i in range(n_layers):
        cp = pltpu.make_async_copy(w_hbm[i], w_vmem[i], sems.at[i])
        cp.start()
        copies.append(cp)

    h = x_ref[...]  # f32 activations, stay vreg/VMEM resident
    off = 0
    for i in range(n_layers):
        copies[i].wait()
        out_dim = w_vmem[i].shape[1]
        w = w_vmem[i][...]                          # bf16 weight tile
        b = bias_ref[:, off:off + out_dim]          # static, lane-aligned slice (f32)
        h = jnp.dot(h.astype(jnp.bfloat16), w,
                    preferred_element_type=jnp.float32) + b
        if i < n_layers - 1:
            h = jnp.tanh(h)                         # f32 EUP path (v5e-safe)
        off += out_dim
    o_ref[...] = h.astype(o_ref.dtype)


def fused_mlp(x_padded, bias_cat, weights):
    """Single pallas_call for the whole MLP. Returns padded (batch, 128) logits."""
    batch = x_padded.shape[0]
    padded_out = weights[-1].shape[1]
    n_layers = len(weights)

    flops = 2 * batch * sum(int(w.shape[0]) * int(w.shape[1]) for w in weights)
    transcendentals = batch * sum(int(w.shape[1]) for w in weights[:-1])
    bytes_accessed = (
        x_padded.size * 4 + bias_cat.size * 4
        + sum(int(w.size) * 2 for w in weights)
        + batch * padded_out * 4
    )

    return pl.pallas_call(
        _fused_mlp_kernel,
        out_shape=jax.ShapeDtypeStruct((batch, padded_out), jnp.float32),
        in_specs=(
            [pl.BlockSpec(memory_space=pltpu.MemorySpace.VMEM),   # x
             pl.BlockSpec(memory_space=pltpu.MemorySpace.VMEM)]   # concatenated biases
            + [pl.BlockSpec(memory_space=pl.ANY)] * n_layers      # weights stay in HBM
        ),
        out_specs=pl.BlockSpec(memory_space=pltpu.MemorySpace.VMEM),
        scratch_shapes=(
            [pltpu.VMEM(w.shape, w.dtype) for w in weights]       # per-layer weight buffers
            + [pltpu.SemaphoreType.DMA((n_layers,))]
        ),
        cost_estimate=pl.CostEstimate(
            flops=flops,
            transcendentals=transcendentals,
            bytes_accessed=bytes_accessed,
        ),
    )(x_padded, bias_cat, *weights)


def init_params(key, num_classes, num_features):
    """Deterministic init mimicking the layer shapes in pytorch_model.__init__.

    Weights stored as (in_features, out_features) (transposed vs. nn.Linear),
    biases as (out_features,), f32.
    """
    dims = [num_features, 1024, 512, 256, 128, num_classes]
    params = []
    for i in range(len(dims) - 1):
        key, kw, kb = jax.random.split(key, 3)
        bound = 1.0 / jnp.sqrt(dims[i])
        w = jax.random.uniform(kw, (dims[i], dims[i + 1]), jnp.float32, -bound, bound)
        b = jax.random.uniform(kb, (dims[i + 1],), jnp.float32, -bound, bound)
        params.append((w, b))
    return params


def prepare_params(params):
    """One-time prep (hoisted out of the forward path):
       - first layer input dim padded to a multiple of 128 (matches padded x),
       - classifier output padded to a multiple of 128 (lane-dense store),
       - weights cast to bf16 (halves HBM traffic), biases kept f32 and
         concatenated into a single (1, total_out) lane-aligned buffer."""
    n = len(params)
    weights, biases = [], []
    for idx, (w, b) in enumerate(params):
        if idx == 0:
            in_pad = _round_up(w.shape[0], _LANE) - w.shape[0]
            if in_pad:
                w = jnp.pad(w, ((0, in_pad), (0, 0)))
        if idx == n - 1:
            out_pad = _round_up(w.shape[1], _LANE) - w.shape[1]
            if out_pad:
                w = jnp.pad(w, ((0, 0), (0, out_pad)))
                b = jnp.pad(b, ((0, out_pad),))
        weights.append(w.astype(jnp.bfloat16))
        biases.append(b.astype(jnp.float32))
    bias_cat = jnp.concatenate(biases).reshape(1, -1)
    return tuple(weights), bias_cat


@functools.partial(jax.jit, static_argnames=("num_classes",))
def mlp_forward(x, weights, bias_cat, *, num_classes):
    pad = weights[0].shape[0] - x.shape[1]
    x_p = jnp.pad(x, ((0, 0), (0, pad))) if pad > 0 else x
    out_padded = fused_mlp(x_p, bias_cat, weights)
    return out_padded[:, :num_classes]


if __name__ == "__main__":
    num_classes = 10
    num_features = 32
    batch = 8

    key = jax.random.PRNGKey(0)
    key, kx = jax.random.split(key)
    x = jax.random.normal(kx, (batch, num_features), jnp.float32)

    params = init_params(key, num_classes, num_features)
    weights, bias_cat = prepare_params(params)

    out = mlp_forward(x, weights, bias_cat, num_classes=num_classes)
    jax.block_until_ready(out)
    assert out.shape == (batch, num_classes)

    # Reference 1: same numerics as the kernel (bf16 weights, f32 accumulate/activations).
    ref_bf16 = x
    for idx, (w, b) in enumerate(params):
        ref_bf16 = jnp.dot(ref_bf16.astype(jnp.bfloat16), w.astype(jnp.bfloat16),
                           preferred_element_type=jnp.float32) + b
        if idx != len(params) - 1:
            ref_bf16 = jnp.tanh(ref_bf16)
    assert jnp.allclose(out, ref_bf16, atol=2e-3, rtol=2e-3)

    # Reference 2: full-f32 PyTorch-equivalent forward (looser tolerance: weights
    # are stored bf16 in the kernel, per performance review).
    ref_f32 = x
    for idx, (w, b) in enumerate(params):
        ref_f32 = ref_f32 @ w + b
        if idx != len(params) - 1:
            ref_f32 = jnp.tanh(ref_f32)
    assert jnp.allclose(out, ref_f32, atol=5e-2, rtol=5e-2)

    print("KERNEL_OK")
</pallas_src>

<mosaic_0001>
module attributes {stable_mosaic.version = 11 : i64} {
  func.func @_fused_mlp_kernel(%arg0: memref<8x128xf32, #tpu.memory_space<vmem>>, %arg1: memref<1x2048xf32, #tpu.memory_space<vmem>>, %arg2: memref<128x1024xbf16, #tpu.memory_space<any>>, %arg3: memref<1024x512xbf16, #tpu.memory_space<any>>, %arg4: memref<512x256xbf16, #tpu.memory_space<any>>, %arg5: memref<256x128xbf16, #tpu.memory_space<any>>, %arg6: memref<128x128xbf16, #tpu.memory_space<any>>, %arg7: memref<8x128xf32, #tpu.memory_space<vmem>>, %arg8: memref<128x1024xbf16, #tpu.memory_space<vmem>>, %arg9: memref<1024x512xbf16, #tpu.memory_space<vmem>>, %arg10: memref<512x256xbf16, #tpu.memory_space<vmem>>, %arg11: memref<256x128xbf16, #tpu.memory_space<vmem>>, %arg12: memref<128x128xbf16, #tpu.memory_space<vmem>>, %arg13: memref<5x!tpu.dma_semaphore, #tpu.memory_space<semaphore_mem>>) attributes {dimension_semantics = [], scalar_prefetch = 0 : i64, scratch_operands = 6 : i64, tpu.core_type = #tpu.core_type<tc>} {
    %c0_i32 = arith.constant 0 : i32
    %0 = tpu.memref_slice %arg13[%c0_i32] : memref<5x!tpu.dma_semaphore, #tpu.memory_space<semaphore_mem>> -> memref<1x!tpu.dma_semaphore, #tpu.memory_space<semaphore_mem>>
    %1 = tpu.memref_squeeze %0 : memref<1x!tpu.dma_semaphore, #tpu.memory_space<semaphore_mem>> -> memref<!tpu.dma_semaphore, #tpu.memory_space<semaphore_mem>>
    tpu.enqueue_dma source(%arg2 : memref<128x1024xbf16, #tpu.memory_space<any>>) target(%arg8 : memref<128x1024xbf16, #tpu.memory_space<vmem>>) target_semaphore(%1 : memref<!tpu.dma_semaphore, #tpu.memory_space<semaphore_mem>>)
    %c1_i32 = arith.constant 1 : i32
    %2 = tpu.memref_slice %arg13[%c1_i32] : memref<5x!tpu.dma_semaphore, #tpu.memory_space<semaphore_mem>> -> memref<1x!tpu.dma_semaphore, #tpu.memory_space<semaphore_mem>>
    %3 = tpu.memref_squeeze %2 : memref<1x!tpu.dma_semaphore, #tpu.memory_space<semaphore_mem>> -> memref<!tpu.dma_semaphore, #tpu.memory_space<semaphore_mem>>
    tpu.enqueue_dma source(%arg3 : memref<1024x512xbf16, #tpu.memory_space<any>>) target(%arg9 : memref<1024x512xbf16, #tpu.memory_space<vmem>>) target_semaphore(%3 : memref<!tpu.dma_semaphore, #tpu.memory_space<semaphore_mem>>)
    %c2_i32 = arith.constant 2 : i32
    %4 = tpu.memref_slice %arg13[%c2_i32] : memref<5x!tpu.dma_semaphore, #tpu.memory_space<semaphore_mem>> -> memref<1x!tpu.dma_semaphore, #tpu.memory_space<semaphore_mem>>
    %5 = tpu.memref_squeeze %4 : memref<1x!tpu.dma_semaphore, #tpu.memory_space<semaphore_mem>> -> memref<!tpu.dma_semaphore, #tpu.memory_space<semaphore_mem>>
    tpu.enqueue_dma source(%arg4 : memref<512x256xbf16, #tpu.memory_space<any>>) target(%arg10 : memref<512x256xbf16, #tpu.memory_space<vmem>>) target_semaphore(%5 : memref<!tpu.dma_semaphore, #tpu.memory_space<semaphore_mem>>)
    %c3_i32 = arith.constant 3 : i32
    %6 = tpu.memref_slice %arg13[%c3_i32] : memref<5x!tpu.dma_semaphore, #tpu.memory_space<semaphore_mem>> -> memref<1x!tpu.dma_semaphore, #tpu.memory_space<semaphore_mem>>
    %7 = tpu.memref_squeeze %6 : memref<1x!tpu.dma_semaphore, #tpu.memory_space<semaphore_mem>> -> memref<!tpu.dma_semaphore, #tpu.memory_space<semaphore_mem>>
    tpu.enqueue_dma source(%arg5 : memref<256x128xbf16, #tpu.memory_space<any>>) target(%arg11 : memref<256x128xbf16, #tpu.memory_space<vmem>>) target_semaphore(%7 : memref<!tpu.dma_semaphore, #tpu.memory_space<semaphore_mem>>)
    %c4_i32 = arith.constant 4 : i32
    %8 = tpu.memref_slice %arg13[%c4_i32] : memref<5x!tpu.dma_semaphore, #tpu.memory_space<semaphore_mem>> -> memref<1x!tpu.dma_semaphore, #tpu.memory_space<semaphore_mem>>
    %9 = tpu.memref_squeeze %8 : memref<1x!tpu.dma_semaphore, #tpu.memory_space<semaphore_mem>> -> memref<!tpu.dma_semaphore, #tpu.memory_space<semaphore_mem>>
    tpu.enqueue_dma source(%arg6 : memref<128x128xbf16, #tpu.memory_space<any>>) target(%arg12 : memref<128x128xbf16, #tpu.memory_space<vmem>>) target_semaphore(%9 : memref<!tpu.dma_semaphore, #tpu.memory_space<semaphore_mem>>)
    %c0 = arith.constant 0 : index
    %c0_0 = arith.constant 0 : index
    %10 = vector.load %arg0[%c0, %c0_0] : memref<8x128xf32, #tpu.memory_space<vmem>>, vector<8x128xf32>
    %c0_i32_1 = arith.constant 0 : i32
    %11 = tpu.memref_slice %arg13[%c0_i32_1] : memref<5x!tpu.dma_semaphore, #tpu.memory_space<semaphore_mem>> -> memref<1x!tpu.dma_semaphore, #tpu.memory_space<semaphore_mem>>
    %12 = tpu.memref_squeeze %11 : memref<1x!tpu.dma_semaphore, #tpu.memory_space<semaphore_mem>> -> memref<!tpu.dma_semaphore, #tpu.memory_space<semaphore_mem>>
    tpu.wait_dma2 semaphore(%12 : memref<!tpu.dma_semaphore, #tpu.memory_space<semaphore_mem>>) src(%arg2 : memref<128x1024xbf16, #tpu.memory_space<any>>) dst(%arg8 : memref<128x1024xbf16, #tpu.memory_space<vmem>>)
    %c0_2 = arith.constant 0 : index
    %c0_3 = arith.constant 0 : index
    %13 = vector.load %arg8[%c0_2, %c0_3] : memref<128x1024xbf16, #tpu.memory_space<vmem>>, vector<128x1024xbf16>
    %c0_4 = arith.constant 0 : index
    %c0_5 = arith.constant 0 : index
    %14 = vector.load %arg1[%c0_4, %c0_5] : memref<1x2048xf32, #tpu.memory_space<vmem>>, vector<1x1024xf32>
    %15 = arith.truncf %10 : vector<8x128xf32> to vector<8x128xbf16>
    %cst = arith.constant dense<0.000000e+00> : vector<8x1024xf32>
    %16 = tpu.matmul %15, %13, %cst {dimension_numbers = #tpu.dot_dimension_numbers<[1], [0], [0], [1], [0, 0, 1, 1], [], []>} : vector<8x128xbf16>, vector<128x1024xbf16>, vector<8x1024xf32> -> vector<8x1024xf32>
    %17 = vector.broadcast %14 : vector<1x1024xf32> to vector<8x1024xf32>
    %18 = arith.addf %16, %17 : vector<8x1024xf32>
    %19 = math.tanh %18 : vector<8x1024xf32>
    %c1_i32_6 = arith.constant 1 : i32
    %20 = tpu.memref_slice %arg13[%c1_i32_6] : memref<5x!tpu.dma_semaphore, #tpu.memory_space<semaphore_mem>> -> memref<1x!tpu.dma_semaphore, #tpu.memory_space<semaphore_mem>>
    %21 = tpu.memref_squeeze %20 : memref<1x!tpu.dma_semaphore, #tpu.memory_space<semaphore_mem>> -> memref<!tpu.dma_semaphore, #tpu.memory_space<semaphore_mem>>
    tpu.wait_dma2 semaphore(%21 : memref<!tpu.dma_semaphore, #tpu.memory_space<semaphore_mem>>) src(%arg3 : memref<1024x512xbf16, #tpu.memory_space<any>>) dst(%arg9 : memref<1024x512xbf16, #tpu.memory_space<vmem>>)
    %c0_7 = arith.constant 0 : index
    %c0_8 = arith.constant 0 : index
    %22 = vector.load %arg9[%c0_7, %c0_8] : memref<1024x512xbf16, #tpu.memory_space<vmem>>, vector<1024x512xbf16>
    %c0_9 = arith.constant 0 : index
    %c1024 = arith.constant 1024 : index
    %23 = vector.load %arg1[%c0_9, %c1024] : memref<1x2048xf32, #tpu.memory_space<vmem>>, vector<1x512xf32>
    %24 = arith.truncf %19 : vector<8x1024xf32> to vector<8x1024xbf16>
    %cst_10 = arith.constant dense<0.000000e+00> : vector<8x512xf32>
    %25 = tpu.matmul %24, %22, %cst_10 {dimension_numbers = #tpu.dot_dimension_numbers<[1], [0], [0], [1], [0, 0, 1, 1], [], []>} : vector<8x1024xbf16>, vector<1024x512xbf16>, vector<8x512xf32> -> vector<8x512xf32>
    %26 = vector.broadcast %23 : vector<1x512xf32> to vector<8x512xf32>
    %27 = arith.addf %25, %26 : vector<8x512xf32>
    %28 = math.tanh %27 : vector<8x512xf32>
    %c2_i32_11 = arith.constant 2 : i32
    %29 = tpu.memref_slice %arg13[%c2_i32_11] : memref<5x!tpu.dma_semaphore, #tpu.memory_space<semaphore_mem>> -> memref<1x!tpu.dma_semaphore, #tpu.memory_space<semaphore_mem>>
    %30 = tpu.memref_squeeze %29 : memref<1x!tpu.dma_semaphore, #tpu.memory_space<semaphore_mem>> -> memref<!tpu.dma_semaphore, #tpu.memory_space<semaphore_mem>>
    tpu.wait_dma2 semaphore(%30 : memref<!tpu.dma_semaphore, #tpu.memory_space<semaphore_mem>>) src(%arg4 : memref<512x256xbf16, #tpu.memory_space<any>>) dst(%arg10 : memref<512x256xbf16, #tpu.memory_space<vmem>>)
    %c0_12 = arith.constant 0 : index
    %c0_13 = arith.constant 0 : index
    %31 = vector.load %arg10[%c0_12, %c0_13] : memref<512x256xbf16, #tpu.memory_space<vmem>>, vector<512x256xbf16>
    %c0_14 = arith.constant 0 : index
    %c1536 = arith.constant 1536 : index
    %32 = vector.load %arg1[%c0_14, %c1536] : memref<1x2048xf32, #tpu.memory_space<vmem>>, vector<1x256xf32>
    %33 = arith.truncf %28 : vector<8x512xf32> to vector<8x512xbf16>
    %cst_15 = arith.constant dense<0.000000e+00> : vector<8x256xf32>
    %34 = tpu.matmul %33, %31, %cst_15 {dimension_numbers = #tpu.dot_dimension_numbers<[1], [0], [0], [1], [0, 0, 1, 1], [], []>} : vector<8x512xbf16>, vector<512x256xbf16>, vector<8x256xf32> -> vector<8x256xf32>
    %35 = vector.broadcast %32 : vector<1x256xf32> to vector<8x256xf32>
    %36 = arith.addf %34, %35 : vector<8x256xf32>
    %37 = math.tanh %36 : vector<8x256xf32>
    %c3_i32_16 = arith.constant 3 : i32
    %38 = tpu.memref_slice %arg13[%c3_i32_16] : memref<5x!tpu.dma_semaphore, #tpu.memory_space<semaphore_mem>> -> memref<1x!tpu.dma_semaphore, #tpu.memory_space<semaphore_mem>>
    %39 = tpu.memref_squeeze %38 : memref<1x!tpu.dma_semaphore, #tpu.memory_space<semaphore_mem>> -> memref<!tpu.dma_semaphore, #tpu.memory_space<semaphore_mem>>
    tpu.wait_dma2 semaphore(%39 : memref<!tpu.dma_semaphore, #tpu.memory_space<semaphore_mem>>) src(%arg5 : memref<256x128xbf16, #tpu.memory_space<any>>) dst(%arg11 : memref<256x128xbf16, #tpu.memory_space<vmem>>)
    %c0_17 = arith.constant 0 : index
    %c0_18 = arith.constant 0 : index
    %40 = vector.load %arg11[%c0_17, %c0_18] : memref<256x128xbf16, #tpu.memory_space<vmem>>, vector<256x128xbf16>
    %c0_19 = arith.constant 0 : index
    %c1792 = arith.constant 1792 : index
    %41 = vector.load %arg1[%c0_19, %c1792] : memref<1x2048xf32, #tpu.memory_space<vmem>>, vector<1x128xf32>
    %42 = arith.truncf %37 : vector<8x256xf32> to vector<8x256xbf16>
    %cst_20 = arith.constant dense<0.000000e+00> : vector<8x128xf32>
    %43 = tpu.matmul %42, %40, %cst_20 {dimension_numbers = #tpu.dot_dimension_numbers<[1], [0], [0], [1], [0, 0, 1, 1], [], []>} : vector<8x256xbf16>, vector<256x128xbf16>, vector<8x128xf32> -> vector<8x128xf32>
    %44 = vector.broadcast %41 : vector<1x128xf32> to vector<8x128xf32>
    %45 = arith.addf %43, %44 : vector<8x128xf32>
    %46 = math.tanh %45 : vector<8x128xf32>
    %c4_i32_21 = arith.constant 4 : i32
    %47 = tpu.memref_slice %arg13[%c4_i32_21] : memref<5x!tpu.dma_semaphore, #tpu.memory_space<semaphore_mem>> -> memref<1x!tpu.dma_semaphore, #tpu.memory_space<semaphore_mem>>
    %48 = tpu.memref_squeeze %47 : memref<1x!tpu.dma_semaphore, #tpu.memory_space<semaphore_mem>> -> memref<!tpu.dma_semaphore, #tpu.memory_space<semaphore_mem>>
    tpu.wait_dma2 semaphore(%48 : memref<!tpu.dma_semaphore, #tpu.memory_space<semaphore_mem>>) src(%arg6 : memref<128x128xbf16, #tpu.memory_space<any>>) dst(%arg12 : memref<128x128xbf16, #tpu.memory_space<vmem>>)
    %c0_22 = arith.constant 0 : index
    %c0_23 = arith.constant 0 : index
    %49 = vector.load %arg12[%c0_22, %c0_23] : memref<128x128xbf16, #tpu.memory_space<vmem>>, vector<128x128xbf16>
    %c0_24 = arith.constant 0 : index
    %c1920 = arith.constant 1920 : index
    %50 = vector.load %arg1[%c0_24, %c1920] : memref<1x2048xf32, #tpu.memory_space<vmem>>, vector<1x128xf32>
    %51 = arith.truncf %46 : vector<8x128xf32> to vector<8x128xbf16>
    %cst_25 = arith.constant dense<0.000000e+00> : vector<8x128xf32>
    %52 = tpu.matmul %51, %49, %cst_25 {dimension_numbers = #tpu.dot_dimension_numbers<[1], [0], [0], [1], [0, 0, 1, 1], [], []>} : vector<8x128xbf16>, vector<128x128xbf16>, vector<8x128xf32> -> vector<8x128xf32>
    %53 = vector.broadcast %50 : vector<1x128xf32> to vector<8x128xf32>
    %54 = arith.addf %52, %53 : vector<8x128xf32>
    %c0_26 = arith.constant 0 : index
    %c0_27 = arith.constant 0 : index
    %55 = vector.load %arg7[%c0_26, %c0_27] : memref<8x128xf32, #tpu.memory_space<vmem>>, vector<8x128xf32>
    tpu.vector_store %arg7[%c0_26, %c0_27], %54 {strides = array<i32>} : memref<8x128xf32, #tpu.memory_space<vmem>>, vector<8x128xf32>,
    return
  }
}

</mosaic_0001>

<bundles_post_ra>
// kernel: mlp_forward.1
= control target key start
LH: loop header
LB: loop body
LE: loop exit
PB: predicated region body
PF: predicated region fallthrough
CT: control target
= control target key end

     0   :  { %12 = vsyncpa [#allocation9], 0  ;;  %s4558_s26 = smov [#allocation2]   ;;  %s4559_s28 = smov [#allocation3]   ;;  %s4749_s0 = inlined_call_operand.vmem [shape: f32[8,128], index: 0, kind: input, shape index: {}]   ;;  %s4750_s1 = inlined_call_operand.vmem [shape: f32[1,2048], index: 1, kind: input, shape index: {}]   ;;  %s4751_s2 = inlined_call_operand.hbm [shape: bf16[128,1024], index: 2, kind: input, shape index: {}]   ;;  %s4752_s3 = inlined_call_operand.hbm [shape: bf16[1024,512], index: 3, kind: input, shape index: {}]   ;;  %s4753_s4 = inlined_call_operand.hbm [shape: bf16[512,256], index: 4, kind: input, shape index: {}]   ;;  %s4754_s5 = inlined_call_operand.hbm [shape: bf16[256,128], index: 5, kind: input, shape index: {}]   ;;  %s4755_s6 = inlined_call_operand.hbm [shape: bf16[128,128], index: 6, kind: input, shape index: {}]   ;;  %s4756_s7 = inlined_call_operand.hbm [shape: f32[8,128], index: 7, kind: output, shape index: {}]  }
   0x1   :  { %v4610_v0 = vld [vmem:[%s4749_s0] sm:$0xff]  ;;  %s25_s27 = sshll.u32 %s4558_s26, 4  ;;  %s37_s29 = sshll.u32 %s4559_s28, 4  ;;  %s26_s27 = int_to_ptr.vmem [resolvable:$true] %s25_s27  ;;  %s38_s29 = int_to_ptr.vmem [resolvable:$true] %s37_s29 }
   0x2   :  { %s4434_s30 = scalar_lea.vmem %s26_s27, 8192  ;;  %p4439_p1 = scmp.lt.s32.totalorder %s26_s27, %s26_s27 }
   0x3   :  { %p4435_p0 = scmp.ne.s32.totalorder %s26_s27, %s4434_s30  ;;  %p4440_p2 = scmp.lt.s32.totalorder %s4434_s30, %s4434_s30 }
   0x5   :  { %p4441_p3 = por %p4440_p2, %p4439_p1 }
   0x7   :  { %p4442_p4 = pnand %p4441_p3, %p4435_p0 }
   0x9   :  { %4445 = shalt.err (!%p4442_p4)  }
   0xa   :  { %28 = dma.hbm_to_vmem [thread:$0]  %s4751_s2, 8192, %s26_s27, [#allocation7] }
   0xb   :  { %s4454_s10 = scalar_lea.vmem %s38_s29, 32768  ;;  %p4459_p6 = scmp.lt.s32.totalorder %s38_s29, %s38_s29 }
   0xc   :  { %p4455_p5 = scmp.ne.s32.totalorder %s38_s29, %s4454_s10  ;;  %p4460_p7 = scmp.lt.s32.totalorder %s4454_s10, %s4454_s10 }
   0xe   :  { %p4461_p8 = por %p4460_p7, %p4459_p6 }
  0x10   :  { %p4462_p9 = pnand %p4461_p8, %p4455_p5 }
  0x12   :  { %4465 = shalt.err (!%p4462_p9)  }
  0x13   :  { %40 = dma.hbm_to_vmem [thread:$0]  %s4752_s3, 32768, %s38_s29, [#allocation7 + $0x1] }
  0x14   :  { %s4560_s12 = smov [#allocation4]   ;;  %s4561_s14 = smov [#allocation5]  }
  0x15   :  { %s49_s13 = sshll.u32 %s4560_s12, 4  ;;  %s61_s15 = sshll.u32 %s4561_s14, 4  ;;  %s50_s13 = int_to_ptr.vmem [resolvable:$true] %s49_s13  ;;  %s62_s15 = int_to_ptr.vmem [resolvable:$true] %s61_s15 }
  0x16   :  { %s4474_s16 = scalar_lea.vmem %s50_s13, 8192  ;;  %p4479_p11 = scmp.lt.s32.totalorder %s50_s13, %s50_s13 }
  0x17   :  { %p4475_p10 = scmp.ne.s32.totalorder %s50_s13, %s4474_s16  ;;  %p4480_p12 = scmp.lt.s32.totalorder %s4474_s16, %s4474_s16 }
  0x19   :  { %p4481_p13 = por %p4480_p12, %p4479_p11 }
  0x1b   :  { %p4482_p0 = pnand %p4481_p13, %p4475_p10 }
  0x1d   :  { %4485 = shalt.err (!%p4482_p0)  }
  0x1e   :  { %52 = dma.hbm_to_vmem [thread:$0]  %s4753_s4, 8192, %s50_s13, [#allocation7 + $0x2] }
  0x1f   :  { %s4494_s18 = scalar_lea.vmem %s62_s15, 2048  ;;  %p4499_p2 = scmp.lt.s32.totalorder %s62_s15, %s62_s15 }
  0x20   :  { %p4495_p1 = scmp.ne.s32.totalorder %s62_s15, %s4494_s18  ;;  %p4500_p3 = scmp.lt.s32.totalorder %s4494_s18, %s4494_s18 }
  0x22   :  { %p4501_p4 = por %p4500_p3, %p4499_p2 }
  0x24   :  { %p4502_p5 = pnand %p4501_p4, %p4495_p1 }
  0x26   :  { %4505 = shalt.err (!%p4502_p5)  }
  0x27   :  { %64 = dma.hbm_to_vmem [thread:$0]  %s4754_s5, 2048, %s62_s15, [#allocation7 + $0x3] }
  0x28   :  { %s4562_s20 = smov [#allocation6]  }
  0x29   :  { %s73_s21 = sshll.u32 %s4562_s20, 4  ;;  %s74_s21 = int_to_ptr.vmem [resolvable:$true] %s73_s21 }
  0x2a   :  { %s4514_s22 = scalar_lea.vmem %s74_s21, 1024  ;;  %p4519_p7 = scmp.lt.s32.totalorder %s74_s21, %s74_s21 }
  0x2b   :  { %p4515_p6 = scmp.ne.s32.totalorder %s74_s21, %s4514_s22  ;;  %p4520_p8 = scmp.lt.s32.totalorder %s4514_s22, %s4514_s22 }
  0x2d   :  { %p4521_p9 = por %p4520_p8, %p4519_p7 }
  0x2f   :  { %p4522_p10 = pnand %p4521_p9, %p4515_p6 }
  0x31   :  { %4525 = shalt.err (!%p4522_p10)  }
  0x32   :  { %76 = dma.hbm_to_vmem [thread:$0]  %s4755_s6, 1024, %s74_s21, [#allocation7 + $0x4] }
  0x33   :  { %4546 = dma.done.wait [#allocation7], 8192 }
  0x34   :  { %4547 = vsyncadd [#allocation7], 4294959104  ;;  %v4563_v1 = vmov 0   ;;  %v138_v2 = vld [vmem:[#allocation2 + $0x1c0] sm:$0xff]  ;;  %v139_v4 = vld [vmem:[#allocation2 + $0x1c8] sm:$0xff] }
  0x35   :  { %541 = vmatprep.mubr.bf16.mxu0 %v4563_v1  ;;  %582 = vmatprep.mubr.bf16.mxu1 %v4563_v1  ;;  %v142_v3 = vld [vmem:[#allocation2 + $0x1e0] sm:$0xff]  ;;  %v143_v6 = vld [vmem:[#allocation2 + $0x1e8] sm:$0xff] }
  0x36   :  { %v3474_v5 = vcombine.high %v138_v2, %v142_v3  ;;  %v3473_v7 = vcombine.low %v138_v2, %v142_v3  ;;  %v130_v8 = vld [vmem:[#allocation2 + $0x180] sm:$0xff]  ;;  %v3476_v10 = vcombine.high %v139_v4, %v143_v6  ;;  %v3475_v11 = vcombine.low %v139_v4, %v143_v6  ;;  %v131_v13 = vld [vmem:[#allocation2 + $0x188] sm:$0xff]  ;;  %v140_v2 = vld [vmem:[#allocation2 + $0x1d0] sm:$0xff] }
  0x37   :  { %v134_v9 = vld [vmem:[#allocation2 + $0x1a0] sm:$0xff]  ;;  %v135_v14 = vld [vmem:[#allocation2 + $0x1a8] sm:$0xff]  ;;  %v144_v3 = vld [vmem:[#allocation2 + $0x1f0] sm:$0xff] }
  0x38   :  { %v3466_v12 = vcombine.high %v130_v8, %v134_v9  ;;  %v122_v15 = vld [vmem:[#allocation2 + $0x140] sm:$0xff]  ;;  %509 = vmatprep.subr.bf16.mxu0 %v3474_v5  ;;  %v3468_v16 = vcombine.high %v131_v13, %v135_v14  ;;  %v123_v18 = vld [vmem:[#allocation2 + $0x148] sm:$0xff]  ;;  %550 = vmatprep.subr.bf16.mxu1 %v3476_v10  ;;  %v3465_v20 = vcombine.low %v130_v8, %v134_v9  ;;  %v141_v4 = vld [vmem:[#allocation2 + $0x1d8] sm:$0xff] }
  0x39   :  { %v126_v17 = vld [vmem:[#allocation2 + $0x160] sm:$0xff]  ;;  %v127_v19 = vld [vmem:[#allocation2 + $0x168] sm:$0xff]  ;;  %510 = vmatpush1.bf16.msra.mxu0 %v3473_v7  ;;  %551 = vmatpush1.bf16.msra.mxu1 %v3475_v11  ;;  %v3467_v21 = vcombine.low %v131_v13, %v135_v14  ;;  %v145_v5 = vld [vmem:[#allocation2 + $0x1f8] sm:$0xff]  ;;  %v3478_v8 = vcombine.high %v140_v2, %v144_v3 }
  0x3a   :  { %511 = vmatprep.subr.bf16.mxu0 %v3466_v12  ;;  %v3458_v22 = vcombine.high %v122_v15, %v126_v17  ;;  %552 = vmatprep.subr.bf16.mxu1 %v3468_v16  ;;  %v3460_v23 = vcombine.high %v123_v18, %v127_v19  ;;  %v114_v24 = vld [vmem:[#allocation2 + $0x100] sm:$0xff]  ;;  %v115_v26 = vld [vmem:[#allocation2 + $0x108] sm:$0xff]  ;;  %v3457_v28 = vcombine.low %v122_v15, %v126_v17  ;;  %v132_v10 = vld [vmem:[#allocation2 + $0x190] sm:$0xff] }
  0x3b   :  { %v118_v25 = vld [vmem:[#allocation2 + $0x120] sm:$0xff]  ;;  %v119_v27 = vld [vmem:[#allocation2 + $0x128] sm:$0xff]  ;;  %v3459_v29 = vcombine.low %v123_v18, %v127_v19  ;;  %v3480_v9 = vcombine.high %v141_v4, %v145_v5  ;;  %v136_v11 = vld [vmem:[#allocation2 + $0x1b0] sm:$0xff]  ;;  %v4631_v12 = vpack.c.bf16 %v4610_v0, %v4610_v0  ;;  %v3477_v15 = vcombine.low %v140_v2, %v144_v3 }
  0x3c   :  { %v3450_v30 = vcombine.high %v114_v24, %v118_v25  ;;  %v3452_v31 = vcombine.high %v115_v26, %v119_v27  ;;  %v106_v32 = vld [vmem:[#allocation2 + $0xc0] sm:$0xff]  ;;  %v107_v34 = vld [vmem:[#allocation2 + $0xc8] sm:$0xff]  ;;  %v3449_v36 = vcombine.low %v114_v24, %v118_v25  ;;  %v3451_v37 = vcombine.low %v115_v26, %v119_v27  ;;  %v133_v13 = vld [vmem:[#allocation2 + $0x198] sm:$0xff] }
  0x3d   :  { %512 = vmatpush1.bf16.msra.mxu0 %v3465_v20  ;;  %553 = vmatpush1.bf16.msra.mxu1 %v3467_v21  ;;  %v110_v33 = vld [vmem:[#allocation2 + $0xe0] sm:$0xff]  ;;  %v111_v35 = vld [vmem:[#allocation2 + $0xe8] sm:$0xff]  ;;  %v137_v14 = vld [vmem:[#allocation2 + $0x1b8] sm:$0xff]  ;;  %v3479_v16 = vcombine.low %v141_v4, %v145_v5  ;;  %v3470_v17 = vcombine.high %v132_v10, %v136_v11  ;;  %v3469_v0 = vcombine.low %v132_v10, %v136_v11  ;;  %v149_v5 = vlaneseq }
  0x3e   :  { %513 = vmatprep.subr.bf16.mxu0 %v3458_v22  ;;  %554 = vmatprep.subr.bf16.mxu1 %v3460_v23  ;;  %v3442_v38 = vcombine.high %v106_v32, %v110_v33  ;;  %v3444_v39 = vcombine.high %v107_v34, %v111_v35  ;;  %v98_v40 = vld [vmem:[#allocation2 + $0x80] sm:$0xff]  ;;  %v99_v42 = vld [vmem:[#allocation2 + $0x88] sm:$0xff]  ;;  %v3441_v44 = vcombine.low %v106_v32, %v110_v33  ;;  %v124_v19 = vld [vmem:[#allocation2 + $0x150] sm:$0xff] }
  0x3f   :  { %v102_v41 = vld [vmem:[#allocation2 + $0xa0] sm:$0xff]  ;;  %v103_v43 = vld [vmem:[#allocation2 + $0xa8] sm:$0xff]  ;;  %v3443_v45 = vcombine.low %v107_v34, %v111_v35  ;;  %v3472_v18 = vcombine.high %v133_v13, %v137_v14  ;;  %v128_v20 = vld [vmem:[#allocation2 + $0x170] sm:$0xff]  ;;  %v3471_v23 = vcombine.low %v133_v13, %v137_v14 }
  0x40   :  { %v3434_v46 = vcombine.high %v98_v40, %v102_v41  ;;  %v3436_v47 = vcombine.high %v99_v42, %v103_v43  ;;  %v90_v48 = vld [vmem:[#allocation2 + $0x40] sm:$0xff]  ;;  %v91_v50 = vld [vmem:[#allocation2 + $0x48] sm:$0xff]  ;;  %v3433_v52 = vcombine.low %v98_v40, %v102_v41  ;;  %v3435_v53 = vcombine.low %v99_v42, %v103_v43  ;;  %v125_v21 = vld [vmem:[#allocation2 + $0x158] sm:$0xff] }
  0x41   :  { %514 = vmatpush1.bf16.msra.mxu0 %v3457_v28  ;;  %555 = vmatpush1.bf16.msra.mxu1 %v3459_v29  ;;  %v94_v49 = vld [vmem:[#allocation2 + $0x60] sm:$0xff]  ;;  %v95_v51 = vld [vmem:[#allocation2 + $0x68] sm:$0xff]  ;;  %v129_v22 = vld [vmem:[#allocation2 + $0x178] sm:$0xff]  ;;  %v3462_v24 = vcombine.high %v124_v19, %v128_v20 }
  0x42   :  { %515 = vmatprep.subr.bf16.mxu0 %v3450_v30  ;;  %556 = vmatprep.subr.bf16.mxu1 %v3452_v31  ;;  %v3426_v54 = vcombine.high %v90_v48, %v94_v49  ;;  %v3428_v55 = vcombine.high %v91_v50, %v95_v51  ;;  %v82_v56 = vld [vmem:[#allocation2] sm:$0xff]  ;;  %v83_v58 = vld [vmem:[#allocation2 + $0x8] sm:$0xff]  ;;  %v3425_v60 = vcombine.low %v90_v48, %v94_v49  ;;  %v116_v26 = vld [vmem:[#allocation2 + $0x110] sm:$0xff] }
  0x43   :  { %v86_v57 = vld [vmem:[#allocation2 + $0x20] sm:$0xff]  ;;  %v87_v59 = vld [vmem:[#allocation2 + $0x28] sm:$0xff]  ;;  %v3427_v61 = vcombine.low %v91_v50, %v95_v51  ;;  %v3464_v25 = vcombine.high %v125_v21, %v129_v22  ;;  %v120_v27 = vld [vmem:[#allocation2 + $0x130] sm:$0xff]  ;;  %v3461_v30 = vcombine.low %v124_v19, %v128_v20  ;;  %v3463_v31 = vcombine.low %v125_v21, %v129_v22 }
  0x44   :  { %v3418_v62 = vcombine.high %v82_v56, %v86_v57  ;;  %v3420_v63 = vcombine.high %v83_v58, %v87_v59  ;;  %v3417_v6 = vcombine.low %v82_v56, %v86_v57  ;;  %v3419_v7 = vcombine.low %v83_v58, %v87_v59  ;;  %v117_v28 = vld [vmem:[#allocation2 + $0x118] sm:$0xff]  ;;  %v108_v34 = vld [vmem:[#allocation2 + $0xd0] sm:$0xff] }
  0x45   :  { %516 = vmatpush1.bf16.msra.mxu0 %v3449_v36  ;;  %557 = vmatpush1.bf16.msra.mxu1 %v3451_v37  ;;  %v121_v29 = vld [vmem:[#allocation2 + $0x138] sm:$0xff]  ;;  %v3454_v32 = vcombine.high %v116_v26, %v120_v27  ;;  %v112_v35 = vld [vmem:[#allocation2 + $0xf0] sm:$0xff] }
  0x46   :  { %517 = vmatprep.subr.bf16.mxu0 %v3442_v38  ;;  %558 = vmatprep.subr.bf16.mxu1 %v3444_v39  ;;  %v3456_v33 = vcombine.high %v117_v28, %v121_v29  ;;  %v109_v36 = vld [vmem:[#allocation2 + $0xd8] sm:$0xff]  ;;  %v3453_v38 = vcombine.low %v116_v26, %v120_v27  ;;  %v3455_v39 = vcombine.low %v117_v28, %v121_v29  ;;  %v100_v41 = vld [vmem:[#allocation2 + $0x90] sm:$0xff] }
  0x47   :  { %v113_v37 = vld [vmem:[#allocation2 + $0xf8] sm:$0xff]  ;;  %v3446_v40 = vcombine.high %v108_v34, %v112_v35  ;;  %v104_v42 = vld [vmem:[#allocation2 + $0xb0] sm:$0xff] }
  0x48   :  { %v101_v43 = vld [vmem:[#allocation2 + $0x98] sm:$0xff]  ;;  %v92_v49 = vld [vmem:[#allocation2 + $0x50] sm:$0xff] }
  0x49   :  { %518 = vmatpush1.bf16.msra.mxu0 %v3441_v44  ;;  %559 = vmatpush1.bf16.msra.mxu1 %v3443_v45  ;;  %v105_v44 = vld [vmem:[#allocation2 + $0xb8] sm:$0xff]  ;;  %v3445_v45 = vcombine.low %v108_v34, %v112_v35  ;;  %v96_v50 = vld [vmem:[#allocation2 + $0x70] sm:$0xff] }
  0x4a   :  { %519 = vmatprep.subr.bf16.mxu0 %v3434_v46  ;;  %560 = vmatprep.subr.bf16.mxu1 %v3436_v47  ;;  %v3447_v46 = vcombine.low %v109_v36, %v113_v37  ;;  %v3438_v47 = vcombine.high %v100_v41, %v104_v42  ;;  %v3440_v48 = vcombine.high %v101_v43, %v105_v44  ;;  %v93_v51 = vld [vmem:[#allocation2 + $0x58] sm:$0xff]  ;;  %v84_v57 = vld [vmem:[#allocation2 + $0x10] sm:$0xff] }
  0x4b   :  { %v88_v58 = vld [vmem:[#allocation2 + $0x30] sm:$0xff]  ;;  %v85_v59 = vld [vmem:[#allocation2 + $0x18] sm:$0xff] }
  0x4c   :  { %v3421_v3 = vcombine.low %v84_v57, %v88_v58 }
  0x4d   :  { %520 = vmatpush1.bf16.msra.mxu0 %v3433_v52  ;;  %561 = vmatpush1.bf16.msra.mxu1 %v3435_v53  ;;  %v97_v52 = vld [vmem:[#allocation2 + $0x78] sm:$0xff]  ;;  %v3437_v53 = vcombine.low %v100_v41, %v104_v42 }
  0x4e   :  { %521 = vmatprep.subr.bf16.mxu0 %v3426_v54  ;;  %562 = vmatprep.subr.bf16.mxu1 %v3428_v55  ;;  %v3439_v54 = vcombine.low %v101_v43, %v105_v44  ;;  %v3430_v55 = vcombine.high %v92_v49, %v96_v50  ;;  %v3432_v56 = vcombine.high %v93_v51, %v97_v52 }
  0x51   :  { %522 = vmatpush1.bf16.msra.mxu0 %v3425_v60  ;;  %563 = vmatpush1.bf16.msra.mxu1 %v3427_v61  ;;  %v89_v60 = vld [vmem:[#allocation2 + $0x38] sm:$0xff]  ;;  %v3429_v61 = vcombine.low %v92_v49, %v96_v50 }
  0x52   :  { %523 = vmatprep.subr.bf16.mxu0 %v3418_v62  ;;  %564 = vmatprep.subr.bf16.mxu1 %v3420_v63  ;;  %v3431_v62 = vcombine.low %v93_v51, %v97_v52  ;;  %v3422_v63 = vcombine.high %v84_v57, %v88_v58  ;;  %v3424_v2 = vcombine.high %v85_v59, %v89_v60 }
  0x53   :  { %v3423_v4 = vcombine.low %v85_v59, %v89_v60 }
  0x55   :  { %524 = vmatpush1.bf16.msra.mxu0 %v3417_v6  ;;  %565 = vmatpush1.bf16.msra.mxu1 %v3419_v7  ;;  %v4639_v6 = vshrl.u32 %v149_v5, 7 }
  0x56   :  { %591 = vmatprep.subr.bf16.mxu0 %v3478_v8  ;;  %632 = vmatprep.subr.bf16.mxu1 %v3480_v9  ;;  %v146_v8 = vld [vmem:[%s4750_s1] sm:$0xff] }
  0x57   :  { %v4642_v7 = vsub.s32 0, %v4639_v6  ;;  %v159_v9 = vsub.s32 2, %v4639_v6  ;;  %v4649_v10 = vsub.s32 1, %v4639_v6  ;;  %v163_v11 = vsub.s32 3, %v4639_v6 }
  0x58   :  { %542 = vmatmul.mubr.bf16.vlgmr.msra.gmra.mxu0 %v4631_v12  ;;  %583 = vmatmul.mubr.bf16.vlgmr.msra.gmra.mxu1 %v4631_v12  ;;  %v179_v34 = vsub.s32 7, %v4639_v6 }
  0x59   :  { %592 = vmatpush1.bf16.msra.mxu0 %v3477_v15  ;;  %633 = vmatpush1.bf16.msra.mxu1 %v3479_v16  ;;  %v152_v13 = vrot.slane %v146_v8, %v4642_v7  ;;  %v156_v14 = vrot.slane %v146_v8, %v4649_v10  ;;  %v164_v16 = vrot.slane %v146_v8, %v163_v11 }
  0x5a   :  { %593 = vmatprep.subr.bf16.mxu0 %v3470_v17  ;;  %634 = vmatprep.subr.bf16.mxu1 %v3472_v18 }
  0x5b   :  { %623 = vmatprep.mubr.bf16.mxu0 %v4563_v1  ;;  %664 = vmatprep.mubr.bf16.mxu1 %v4563_v1  ;;  %v3448_v1 = vcombine.high %v109_v36, %v113_v37 }
  0x5d   :  { %594 = vmatpush1.bf16.msra.mxu0 %v3469_v0  ;;  %635 = vmatpush1.bf16.msra.mxu1 %v3471_v23 }
  0x5e   :  { %595 = vmatprep.subr.bf16.mxu0 %v3462_v24  ;;  %636 = vmatprep.subr.bf16.mxu1 %v3464_v25 }
  0x61   :  { %596 = vmatpush1.bf16.msra.mxu0 %v3461_v30  ;;  %637 = vmatpush1.bf16.msra.mxu1 %v3463_v31  ;;  %v167_v31 = vsub.s32 4, %v4639_v6 }
  0x62   :  { %597 = vmatprep.subr.bf16.mxu0 %v3454_v32  ;;  %638 = vmatprep.subr.bf16.mxu1 %v3456_v33  ;;  %v175_v32 = vsub.s32 6, %v4639_v6  ;;  %v171_v33 = vsub.s32 5, %v4639_v6 }
  0x63   :  { %v168_v35 = vrot.slane %v146_v8, %v167_v31 }
  0x64   :  { %v176_v36 = vrot.slane %v146_v8, %v175_v32  ;;  %v172_v37 = vrot.slane %v146_v8, %v171_v33 }
  0x65   :  { %598 = vmatpush1.bf16.msra.mxu0 %v3453_v38  ;;  %639 = vmatpush1.bf16.msra.mxu1 %v3455_v39  ;;  %v180_v39 = vrot.slane %v146_v8, %v179_v34 }
  0x66   :  { %599 = vmatprep.subr.bf16.mxu0 %v3446_v40  ;;  %640 = vmatprep.subr.bf16.mxu1 %v3448_v1 }
  0x69   :  { %600 = vmatpush1.bf16.msra.mxu0 %v3445_v45  ;;  %641 = vmatpush1.bf16.msra.mxu1 %v3447_v46 }
  0x6a   :  { %601 = vmatprep.subr.bf16.mxu0 %v3438_v47  ;;  %642 = vmatprep.subr.bf16.mxu1 %v3440_v48 }
  0x6d   :  { %602 = vmatpush1.bf16.msra.mxu0 %v3437_v53  ;;  %643 = vmatpush1.bf16.msra.mxu1 %v3439_v54 }
  0x6e   :  { %603 = vmatprep.subr.bf16.mxu0 %v3430_v55  ;;  %644 = vmatprep.subr.bf16.mxu1 %v3432_v56 }
  0x71   :  { %604 = vmatpush1.bf16.msra.mxu0 %v3429_v61  ;;  %645 = vmatpush1.bf16.msra.mxu1 %v3431_v62 }
  0x72   :  { %605 = vmatprep.subr.bf16.mxu0 %v3422_v63  ;;  %646 = vmatprep.subr.bf16.mxu1 %v3424_v2 }
  0x75   :  { %606 = vmatpush1.bf16.msra.mxu0 %v3421_v3  ;;  %647 = vmatpush1.bf16.msra.mxu1 %v3423_v4 }
  0x78   :  { %624 = vmatmul.mubr.bf16.vlgmr.msra.gmra.mxu0 %v4631_v12  ;;  %665 = vmatmul.mubr.bf16.vlgmr.msra.gmra.mxu1 %v4631_v12  ;;  %v160_v12 = vrot.slane %v146_v8, %v159_v9 }
 0x118   :  { %v543_v15 = vpop.f32.mrf.mxu0  ;;  %v584_v18 = vpop.f32.mrf.mxu1 }
 0x119   :  { %v544_v17 = vadd.f32 %v543_v15, %v152_v13  ;;  %v585_v19 = vadd.f32 %v584_v18, %v160_v12 }
 0x11a   :  { %v545_v20 = vpop.f32.mrf.mxu0  ;;  %v586_v22 = vpop.f32.mrf.mxu1 }
 0x11b   :  { %3892 = vtanh.f32 %v544_v17  ;;  %v546_v21 = vadd.f32 %v545_v20, %v156_v14  ;;  %v587_v0 = vadd.f32 %v586_v22, %v164_v16 }
 0x11c   :  { %3894 = vtanh.f32 %v585_v19  ;;  %v547_v23 = vpop.f32.mrf.mxu0  ;;  %v588_v24 = vpop.f32.mrf.mxu1 }
 0x11d   :  { %3896 = vtanh.f32 %v546_v21 }
 0x11e   :  { %3898 = vtanh.f32 %v587_v0  ;;  %v548_v25 = vpop.f32.mrf.mxu0  ;;  %v589_v26 = vpop.f32.mrf.mxu1 }
 0x128   :  { %v4658_v27 = vpop.eup %3892 }
 0x129   :  { %v4660_v28 = vpop.eup %3894 }
 0x12a   :  { %v3897_v29 = vpop.eup %3896 }
 0x12b   :  { %v3899_v30 = vpop.eup %3898 }
 0x138   :  { %v625_v38 = vpop.f32.mrf.mxu0  ;;  %v666_v1 = vpop.f32.mrf.mxu1 }
 0x139   :  { %v626_v40 = vadd.f32 %v625_v38, %v168_v35  ;;  %v667_v41 = vadd.f32 %v666_v1, %v176_v36 }
 0x13a   :  { %v627_v42 = vpop.f32.mrf.mxu0  ;;  %v668_v44 = vpop.f32.mrf.mxu1 }
 0x13b   :  { %3900 = vtanh.f32 %v626_v40  ;;  %v628_v43 = vadd.f32 %v627_v42, %v172_v37  ;;  %v669_v45 = vadd.f32 %v668_v44, %v180_v39 }
 0x13c   :  { %3902 = vtanh.f32 %v667_v41  ;;  %v629_v46 = vpop.f32.mrf.mxu0  ;;  %v670_v47 = vpop.f32.mrf.mxu1 }
 0x13d   :  { %3904 = vtanh.f32 %v628_v43 }
 0x13e   :  { %3906 = vtanh.f32 %v669_v45  ;;  %v630_v48 = vpop.f32.mrf.mxu0  ;;  %v671_v49 = vpop.f32.mrf.mxu1 }
 0x148   :  { %v4666_v50 = vpop.eup %3900 }
 0x149   :  { %v4668_v51 = vpop.eup %3902 }
 0x14a   :  { %v4670_v52 = vpop.eup %3904 }
 0x14b   :  { %v4672_v53 = vpop.eup %3906 }
 0x14c   :  { %4548 = dma.done.wait [#allocation7 + $0x1], 32768 }
 0x14d   :  { %4549 = vsyncadd [#allocation7 + $0x1], 4294934528  ;;  %v4674_v54 = vpack.c.bf16 %v3897_v29, %v3897_v29  ;;  %v4676_v55 = vpack.c.bf16 %v3899_v30, %v3899_v30  ;;  %v3908_v56 = vld [vmem:[#allocation3 + $0xe4] ss:$16 sps:$4 sm:$0xff]   ;;  %v3912_v58 = vld [vmem:[#allocation3 + $0xe0] ss:$16 sps:$4 sm:$0xff]  }
 0x14e   :  { %v3910_v57 = vld [vmem:[#allocation3 + $0x2e4] ss:$16 sps:$4 sm:$0xff]   ;;  %2251 = vmatprep.subr.bf16.mxu0 %v3908_v56  ;;  %v3913_v59 = vld [vmem:[#allocation3 + $0x2e0] ss:$16 sps:$4 sm:$0xff]  }
 0x14f   :  { %2283 = vmatprep.mubr.bf16.mxu0 %v4674_v54  ;;  %2324 = vmatprep.mubr.bf16.mxu1 %v4676_v55  ;;  %v3914_v60 = vld [vmem:[#allocation3 + $0xc4] ss:$16 sps:$4 sm:$0xff]   ;;  %v3918_v62 = vld [vmem:[#allocation3 + $0xc0] ss:$16 sps:$4 sm:$0xff]  }
 0x150   :  { %2292 = vmatprep.subr.bf16.mxu1 %v3910_v57  ;;  %2252 = vmatpush1.bf16.msra.mxu0 %v3912_v58  ;;  %v3916_v61 = vld [vmem:[#allocation3 + $0x2c4] ss:$16 sps:$4 sm:$0xff]   ;;  %v3919_v63 = vld [vmem:[#allocation3 + $0x2c0] ss:$16 sps:$4 sm:$0xff]  }
 0x151   :  { %2293 = vmatpush1.bf16.msra.mxu1 %v3913_v59  ;;  %2253 = vmatprep.subr.bf16.mxu0 %v3914_v60  ;;  %v3920_v2 = vld [vmem:[#allocation3 + $0xa4] ss:$16 sps:$4 sm:$0xff]   ;;  %v3924_v4 = vld [vmem:[#allocation3 + $0xa0] ss:$16 sps:$4 sm:$0xff]  }
 0x152   :  { %2294 = vmatprep.subr.bf16.mxu1 %v3916_v61  ;;  %v3922_v3 = vld [vmem:[#allocation3 + $0x2a4] ss:$16 sps:$4 sm:$0xff]   ;;  %v3925_v5 = vld [vmem:[#allocation3 + $0x2a0] ss:$16 sps:$4 sm:$0xff]  }
 0x153   :  { %v3926_v8 = vld [vmem:[#allocation3 + $0x84] ss:$16 sps:$4 sm:$0xff]   ;;  %v3930_v12 = vld [vmem:[#allocation3 + $0x80] ss:$16 sps:$4 sm:$0xff]  }
 0x154   :  { %2254 = vmatpush1.bf16.msra.mxu0 %v3918_v62  ;;  %v3928_v13 = vld [vmem:[#allocation3 + $0x284] ss:$16 sps:$4 sm:$0xff]   ;;  %v3931_v14 = vld [vmem:[#allocation3 + $0x280] ss:$16 sps:$4 sm:$0xff]  }
 0x155   :  { %2295 = vmatpush1.bf16.msra.mxu1 %v3919_v63  ;;  %2255 = vmatprep.subr.bf16.mxu0 %v3920_v2  ;;  %v3932_v15 = vld [vmem:[#allocation3 + $0x64] ss:$16 sps:$4 sm:$0xff]   ;;  %v3936_v17 = vld [vmem:[#allocation3 + $0x60] ss:$16 sps:$4 sm:$0xff]  }
 0x156   :  { %2296 = vmatprep.subr.bf16.mxu1 %v3922_v3  ;;  %v3934_v16 = vld [vmem:[#allocation3 + $0x264] ss:$16 sps:$4 sm:$0xff]   ;;  %v3937_v18 = vld [vmem:[#allocation3 + $0x260] ss:$16 sps:$4 sm:$0xff]  }
 0x157   :  { %v3938_v19 = vld [vmem:[#allocation3 + $0x44] ss:$16 sps:$4 sm:$0xff]   ;;  %v3942_v21 = vld [vmem:[#allocation3 + $0x40] ss:$16 sps:$4 sm:$0xff]  }
 0x158   :  { %2256 = vmatpush1.bf16.msra.mxu0 %v3924_v4  ;;  %v3940_v20 = vld [vmem:[#allocation3 + $0x244] ss:$16 sps:$4 sm:$0xff]   ;;  %v3943_v22 = vld [vmem:[#allocation3 + $0x240] ss:$16 sps:$4 sm:$0xff]  }
 0x159   :  { %2297 = vmatpush1.bf16.msra.mxu1 %v3925_v5  ;;  %2257 = vmatprep.subr.bf16.mxu0 %v3926_v8  ;;  %v3944_v0 = vld [vmem:[#allocation3 + $0x24] ss:$16 sps:$4 sm:$0xff]   ;;  %v3948_v24 = vld [vmem:[#allocation3 + $0x20] ss:$16 sps:$4 sm:$0xff]  }
 0x15a   :  { %2298 = vmatprep.subr.bf16.mxu1 %v3928_v13  ;;  %v3946_v23 = vld [vmem:[#allocation3 + $0x224] ss:$16 sps:$4 sm:$0xff]   ;;  %v3949_v25 = vld [vmem:[#allocation3 + $0x220] ss:$16 sps:$4 sm:$0xff]  }
 0x15b   :  { %v3950_v26 = vld [vmem:[#allocation3 + $0x4] ss:$16 sps:$4 sm:$0xff]   ;;  %v3954_v30 = vld [vmem:[#allocation3] ss:$16 sps:$4 sm:$0xff]  }
 0x15c   :  { %2258 = vmatpush1.bf16.msra.mxu0 %v3930_v12  ;;  %v3952_v29 = vld [vmem:[#allocation3 + $0x204] ss:$16 sps:$4 sm:$0xff]   ;;  %v3955_v31 = vld [vmem:[#allocation3 + $0x200] ss:$16 sps:$4 sm:$0xff]  }
 0x15d   :  { %2299 = vmatpush1.bf16.msra.mxu1 %v3931_v14  ;;  %2259 = vmatprep.subr.bf16.mxu0 %v3932_v15  ;;  %v3956_v32 = vld [vmem:[#allocation3 + $0x1e4] ss:$16 sps:$4 sm:$0xff]   ;;  %v3960_v34 = vld [vmem:[#allocation3 + $0x1e0] ss:$16 sps:$4 sm:$0xff]   ;;  %v4682_v14 = vpack.c.bf16 %v4658_v27, %v4658_v27  ;;  %v4686_v15 = vpack.c.bf16 %v4660_v28, %v4660_v28  ;;  %v4694_v27 = vpack.c.bf16 %v4672_v53, %v4672_v53 }
 0x15e   :  { %2300 = vmatprep.subr.bf16.mxu1 %v3934_v16  ;;  %v3958_v33 = vld [vmem:[#allocation3 + $0x3e4] ss:$16 sps:$4 sm:$0xff]   ;;  %v3961_v35 = vld [vmem:[#allocation3 + $0x3e0] ss:$16 sps:$4 sm:$0xff]  }
 0x15f   :  { %v3962_v36 = vld [vmem:[#allocation3 + $0x1c4] ss:$16 sps:$4 sm:$0xff]   ;;  %v3966_v38 = vld [vmem:[#allocation3 + $0x1c0] ss:$16 sps:$4 sm:$0xff]  }
 0x160   :  { %2260 = vmatpush1.bf16.msra.mxu0 %v3936_v17  ;;  %v3964_v37 = vld [vmem:[#allocation3 + $0x3c4] ss:$16 sps:$4 sm:$0xff]   ;;  %v3967_v39 = vld [vmem:[#allocation3 + $0x3c0] ss:$16 sps:$4 sm:$0xff]  }
 0x161   :  { %2301 = vmatpush1.bf16.msra.mxu1 %v3937_v18  ;;  %2261 = vmatprep.subr.bf16.mxu0 %v3938_v19  ;;  %v3968_v40 = vld [vmem:[#allocation3 + $0x1a4] ss:$16 sps:$4 sm:$0xff]   ;;  %v3972_v41 = vld [vmem:[#allocation3 + $0x1a0] ss:$16 sps:$4 sm:$0xff]  }
 0x162   :  { %2302 = vmatprep.subr.bf16.mxu1 %v3940_v20  ;;  %v3970_v1 = vld [vmem:[#allocation3 + $0x3a4] ss:$16 sps:$4 sm:$0xff]   ;;  %v3973_v42 = vld [vmem:[#allocation3 + $0x3a0] ss:$16 sps:$4 sm:$0xff]   ;;  %v4690_v20 = vpack.c.bf16 %v4670_v52, %v4670_v52 }
 0x163   :  { %v3974_v43 = vld [vmem:[#allocation3 + $0x184] ss:$16 sps:$4 sm:$0xff]   ;;  %v3978_v45 = vld [vmem:[#allocation3 + $0x180] ss:$16 sps:$4 sm:$0xff]  }
 0x164   :  { %2262 = vmatpush1.bf16.msra.mxu0 %v3942_v21  ;;  %v3976_v44 = vld [vmem:[#allocation3 + $0x384] ss:$16 sps:$4 sm:$0xff]   ;;  %v3979_v46 = vld [vmem:[#allocation3 + $0x380] ss:$16 sps:$4 sm:$0xff]  }
 0x165   :  { %2303 = vmatpush1.bf16.msra.mxu1 %v3943_v22  ;;  %2263 = vmatprep.subr.bf16.mxu0 %v3944_v0  ;;  %v3980_v47 = vld [vmem:[#allocation3 + $0x164] ss:$16 sps:$4 sm:$0xff]   ;;  %v3984_v49 = vld [vmem:[#allocation3 + $0x160] ss:$16 sps:$4 sm:$0xff]  }
 0x166   :  { %2304 = vmatprep.subr.bf16.mxu1 %v3946_v23  ;;  %v3982_v48 = vld [vmem:[#allocation3 + $0x364] ss:$16 sps:$4 sm:$0xff]   ;;  %v3985_v56 = vld [vmem:[#allocation3 + $0x360] ss:$16 sps:$4 sm:$0xff]  }
 0x167   :  { %v3986_v57 = vld [vmem:[#allocation3 + $0x144] ss:$16 sps:$4 sm:$0xff]   ;;  %v3990_v59 = vld [vmem:[#allocation3 + $0x140] ss:$16 sps:$4 sm:$0xff]  }
 0x168   :  { %2264 = vmatpush1.bf16.msra.mxu0 %v3948_v24  ;;  %v3988_v58 = vld [vmem:[#allocation3 + $0x344] ss:$16 sps:$4 sm:$0xff]   ;;  %v3991_v60 = vld [vmem:[#allocation3 + $0x340] ss:$16 sps:$4 sm:$0xff]  }
 0x169   :  { %2305 = vmatpush1.bf16.msra.mxu1 %v3949_v25  ;;  %2265 = vmatprep.subr.bf16.mxu0 %v3950_v26  ;;  %v3992_v61 = vld [vmem:[#allocation3 + $0x124] ss:$16 sps:$4 sm:$0xff]   ;;  %v3996_v63 = vld [vmem:[#allocation3 + $0x120] ss:$16 sps:$4 sm:$0xff]  }
 0x16a   :  { %2306 = vmatprep.subr.bf16.mxu1 %v3952_v29  ;;  %v3994_v62 = vld [vmem:[#allocation3 + $0x324] ss:$16 sps:$4 sm:$0xff]   ;;  %v3997_v2 = vld [vmem:[#allocation3 + $0x320] ss:$16 sps:$4 sm:$0xff]  }
 0x16b   :  { %v3998_v3 = vld [vmem:[#allocation3 + $0x104] ss:$16 sps:$4 sm:$0xff]   ;;  %v4002_v5 = vld [vmem:[#allocation3 + $0x100] ss:$16 sps:$4 sm:$0xff]  }
 0x16c   :  { %2266 = vmatpush1.bf16.msra.mxu0 %v3954_v30  ;;  %v4000_v4 = vld [vmem:[#allocation3 + $0x304] ss:$16 sps:$4 sm:$0xff]   ;;  %v4003_v8 = vld [vmem:[#allocation3 + $0x300] ss:$16 sps:$4 sm:$0xff]  }
 0x16d   :  { %2307 = vmatpush1.bf16.msra.mxu1 %v3955_v31  ;;  %2267 = vmatprep.subr.bf16.mxu0 %v3956_v32  ;;  %v4006_v13 = vld [vmem:[#allocation3 + $0x4e4] ss:$16 sps:$4 sm:$0xff]   ;;  %v4004_v16 = vld [vmem:[#allocation3 + $0x4e0] ss:$16 sps:$4 sm:$0xff]  }
 0x16e   :  { %2308 = vmatprep.subr.bf16.mxu1 %v3958_v33  ;;  %v4009_v12 = vld [vmem:[#allocation3 + $0x6e4] ss:$16 sps:$4 sm:$0xff]   ;;  %v4007_v17 = vld [vmem:[#allocation3 + $0x6e0] ss:$16 sps:$4 sm:$0xff]  }
 0x16f   :  { %v4012_v18 = vld [vmem:[#allocation3 + $0x4c4] ss:$16 sps:$4 sm:$0xff]   ;;  %v4010_v28 = vld [vmem:[#allocation3 + $0x4c0] ss:$16 sps:$4 sm:$0xff]  }
 0x170   :  { %2268 = vmatpush2.bf16.msra.mxu0 %v3960_v34  ;;  %v4015_v19 = vld [vmem:[#allocation3 + $0x6c4] ss:$16 sps:$4 sm:$0xff]   ;;  %v4013_v21 = vld [vmem:[#allocation3 + $0x6c0] ss:$16 sps:$4 sm:$0xff]  }
 0x171   :  { %2309 = vmatpush2.bf16.msra.mxu1 %v3961_v35  ;;  %2269 = vmatprep.subr.bf16.mxu0 %v3962_v36  ;;  %v4018_v22 = vld [vmem:[#allocation3 + $0x4a4] ss:$16 sps:$4 sm:$0xff]   ;;  %v4016_v52 = vld [vmem:[#allocation3 + $0x4a0] ss:$16 sps:$4 sm:$0xff]  }
 0x172   :  { %2310 = vmatprep.subr.bf16.mxu1 %v3964_v37  ;;  %v4021_v0 = vld [vmem:[#allocation3 + $0x6a4] ss:$16 sps:$4 sm:$0xff]   ;;  %v4019_v23 = vld [vmem:[#allocation3 + $0x6a0] ss:$16 sps:$4 sm:$0xff]  }
 0x173   :  { %v4024_v53 = vld [vmem:[#allocation3 + $0x484] ss:$16 sps:$4 sm:$0xff]   ;;  %v4022_v25 = vld [vmem:[#allocation3 + $0x480] ss:$16 sps:$4 sm:$0xff]  }
 0x174   :  { %2270 = vmatpush2.bf16.msra.mxu0 %v3966_v38  ;;  %v4027_v24 = vld [vmem:[#allocation3 + $0x684] ss:$16 sps:$4 sm:$0xff]   ;;  %v4025_v26 = vld [vmem:[#allocation3 + $0x680] ss:$16 sps:$4 sm:$0xff]  }
 0x175   :  { %2311 = vmatpush2.bf16.msra.mxu1 %v3967_v39  ;;  %2271 = vmatprep.subr.bf16.mxu0 %v3968_v40  ;;  %v4030_v29 = vld [vmem:[#allocation3 + $0x464] ss:$16 sps:$4 sm:$0xff]   ;;  %v4028_v31 = vld [vmem:[#allocation3 + $0x460] ss:$16 sps:$4 sm:$0xff]  }
 0x176   :  { %2312 = vmatprep.subr.bf16.mxu1 %v3970_v1  ;;  %v4033_v30 = vld [vmem:[#allocation3 + $0x664] ss:$16 sps:$4 sm:$0xff]   ;;  %v4031_v32 = vld [vmem:[#allocation3 + $0x660] ss:$16 sps:$4 sm:$0xff]  }
 0x177   :  { %v4036_v33 = vld [vmem:[#allocation3 + $0x444] ss:$16 sps:$4 sm:$0xff]   ;;  %v4034_v35 = vld [vmem:[#allocation3 + $0x440] ss:$16 sps:$4 sm:$0xff]  }
 0x178   :  { %2272 = vmatpush2.bf16.msra.mxu0 %v3972_v41  ;;  %v4039_v34 = vld [vmem:[#allocation3 + $0x644] ss:$16 sps:$4 sm:$0xff]   ;;  %v4037_v36 = vld [vmem:[#allocation3 + $0x640] ss:$16 sps:$4 sm:$0xff]  }
 0x179   :  { %2313 = vmatpush2.bf16.msra.mxu1 %v3973_v42  ;;  %2273 = vmatprep.subr.bf16.mxu0 %v3974_v43  ;;  %v4042_v37 = vld [vmem:[#allocation3 + $0x424] ss:$16 sps:$4 sm:$0xff]   ;;  %v4040_v39 = vld [vmem:[#allocation3 + $0x420] ss:$16 sps:$4 sm:$0xff]  }
 0x17a   :  { %2314 = vmatprep.subr.bf16.mxu1 %v3976_v44  ;;  %v4045_v38 = vld [vmem:[#allocation3 + $0x624] ss:$16 sps:$4 sm:$0xff]   ;;  %v4043_v40 = vld [vmem:[#allocation3 + $0x620] ss:$16 sps:$4 sm:$0xff]  }
 0x17b   :  { %v4048_v1 = vld [vmem:[#allocation3 + $0x404] ss:$16 sps:$4 sm:$0xff]   ;;  %v4046_v42 = vld [vmem:[#allocation3 + $0x400] ss:$16 sps:$4 sm:$0xff]  }
 0x17c   :  { %2274 = vmatpush2.bf16.msra.mxu0 %v3978_v45  ;;  %v4051_v41 = vld [vmem:[#allocation3 + $0x604] ss:$16 sps:$4 sm:$0xff]   ;;  %v4049_v43 = vld [vmem:[#allocation3 + $0x600] ss:$16 sps:$4 sm:$0xff]  }
 0x17d   :  { %2315 = vmatpush2.bf16.msra.mxu1 %v3979_v46  ;;  %2275 = vmatprep.subr.bf16.mxu0 %v3980_v47  ;;  %v4054_v44 = vld [vmem:[#allocation3 + $0x5e4] ss:$16 sps:$4 sm:$0xff]   ;;  %v4052_v46 = vld [vmem:[#allocation3 + $0x5e0] ss:$16 sps:$4 sm:$0xff]  }
 0x17e   :  { %2316 = vmatprep.subr.bf16.mxu1 %v3982_v48  ;;  %v4057_v45 = vld [vmem:[#allocation3 + $0x7e4] ss:$16 sps:$4 sm:$0xff]   ;;  %v4055_v47 = vld [vmem:[#allocation3 + $0x7e0] ss:$16 sps:$4 sm:$0xff]  }
 0x17f   :  { %v4060_v48 = vld [vmem:[#allocation3 + $0x5c4] ss:$16 sps:$4 sm:$0xff]  }
 0x180   :  { %2276 = vmatpush2.bf16.msra.mxu0 %v3984_v49  ;;  %v4063_v49 = vld [vmem:[#allocation3 + $0x7c4] ss:$16 sps:$4 sm:$0xff]  }
 0x181   :  { %2317 = vmatpush2.bf16.msra.mxu1 %v3985_v56  ;;  %2277 = vmatprep.subr.bf16.mxu0 %v3986_v57  ;;  %v4058_v56 = vld [vmem:[#allocation3 + $0x5c0] ss:$16 sps:$4 sm:$0xff]  }
 0x182   :  { %2318 = vmatprep.subr.bf16.mxu1 %v3988_v58  ;;  %v4061_v57 = vld [vmem:[#allocation3 + $0x7c0] ss:$16 sps:$4 sm:$0xff]   ;;  %v4066_v58 = vld [vmem:[#allocation3 + $0x5a4] ss:$16 sps:$4 sm:$0xff]  }
 0x184   :  { %2278 = vmatpush2.bf16.msra.mxu0 %v3990_v59  ;;  %v4069_v59 = vld [vmem:[#allocation3 + $0x7a4] ss:$16 sps:$4 sm:$0xff]  }
 0x185   :  { %2319 = vmatpush2.bf16.msra.mxu1 %v3991_v60  ;;  %2279 = vmatprep.subr.bf16.mxu0 %v3992_v61  ;;  %v4064_v60 = vld [vmem:[#allocation3 + $0x5a0] ss:$16 sps:$4 sm:$0xff]  }
 0x186   :  { %2320 = vmatprep.subr.bf16.mxu1 %v3994_v62  ;;  %v4067_v61 = vld [vmem:[#allocation3 + $0x7a0] ss:$16 sps:$4 sm:$0xff]   ;;  %v4072_v62 = vld [vmem:[#allocation3 + $0x584] ss:$16 sps:$4 sm:$0xff]  }
 0x188   :  { %2280 = vmatpush2.bf16.msra.mxu0 %v3996_v63  ;;  %v4075_v63 = vld [vmem:[#allocation3 + $0x784] ss:$16 sps:$4 sm:$0xff]  }
 0x189   :  { %2321 = vmatpush2.bf16.msra.mxu1 %v3997_v2  ;;  %2281 = vmatprep.subr.bf16.mxu0 %v3998_v3  ;;  %v4070_v2 = vld [vmem:[#allocation3 + $0x580] ss:$16 sps:$4 sm:$0xff]  }
 0x18a   :  { %2322 = vmatprep.subr.bf16.mxu1 %v4000_v4  ;;  %v4073_v3 = vld [vmem:[#allocation3 + $0x780] ss:$16 sps:$4 sm:$0xff]   ;;  %v4078_v4 = vld [vmem:[#allocation3 + $0x564] ss:$16 sps:$4 sm:$0xff]  }
 0x18c   :  { %2282 = vmatpush2.bf16.msra.mxu0 %v4002_v5  ;;  %v4081_v5 = vld [vmem:[#allocation3 + $0x764] ss:$16 sps:$4 sm:$0xff]  }
 0x18d   :  { %2323 = vmatpush2.bf16.msra.mxu1 %v4003_v8  ;;  %2333 = vmatprep.subr.bf16.mxu0 %v4006_v13  ;;  %v4076_v8 = vld [vmem:[#allocation3 + $0x560] ss:$16 sps:$4 sm:$0xff]  }
 0x18e   :  { %2374 = vmatprep.subr.bf16.mxu1 %v4009_v12  ;;  %v4079_v13 = vld [vmem:[#allocation3 + $0x760] ss:$16 sps:$4 sm:$0xff]   ;;  %v4084_v12 = vld [vmem:[#allocation3 + $0x544] ss:$16 sps:$4 sm:$0xff]  }
 0x18f   :  { %2284 = vmatmul.mubr.bf16.vlgmr.msra.gmra.mxu0 %v4682_v14 }
 0x190   :  { %2325 = vmatmul.mubr.bf16.vlgmr.msra.gmra.mxu1 %v4686_v15  ;;  %2334 = vmatpush1.bf16.msra.mxu0 %v4004_v16  ;;  %v4087_v16 = vld [vmem:[#allocation3 + $0x744] ss:$16 sps:$4 sm:$0xff]  }
 0x191   :  { %2375 = vmatpush1.bf16.msra.mxu1 %v4007_v17  ;;  %2335 = vmatprep.subr.bf16.mxu0 %v4012_v18  ;;  %v4082_v17 = vld [vmem:[#allocation3 + $0x540] ss:$16 sps:$4 sm:$0xff]  }
 0x192   :  { %2376 = vmatprep.subr.bf16.mxu1 %v4015_v19  ;;  %2365 = vmatprep.mubr.bf16.mxu0 %v4690_v20  ;;  %v4085_v18 = vld [vmem:[#allocation3 + $0x740] ss:$16 sps:$4 sm:$0xff]   ;;  %v4090_v19 = vld [vmem:[#allocation3 + $0x524] ss:$16 sps:$4 sm:$0xff]  }
 0x193   :  { %2406 = vmatprep.mubr.bf16.mxu1 %v4694_v27 }
 0x194   :  { %2336 = vmatpush1.bf16.msra.mxu0 %v4010_v28  ;;  %v4093_v28 = vld [vmem:[#allocation3 + $0x724] ss:$16 sps:$4 sm:$0xff]  }
 0x195   :  { %2377 = vmatpush1.bf16.msra.mxu1 %v4013_v21  ;;  %2337 = vmatprep.subr.bf16.mxu0 %v4018_v22  ;;  %v4088_v21 = vld [vmem:[#allocation3 + $0x520] ss:$16 sps:$4 sm:$0xff]  }
 0x196   :  { %2378 = vmatprep.subr.bf16.mxu1 %v4021_v0  ;;  %v4091_v22 = vld [vmem:[#allocation3 + $0x720] ss:$16 sps:$4 sm:$0xff]   ;;  %v4096_v0 = vld [vmem:[#allocation3 + $0x504] ss:$16 sps:$4 sm:$0xff]  }
 0x198   :  { %2338 = vmatpush1.bf16.msra.mxu0 %v4016_v52  ;;  %v4099_v52 = vld [vmem:[#allocation3 + $0x704] ss:$16 sps:$4 sm:$0xff]  }
 0x199   :  { %2379 = vmatpush1.bf16.msra.mxu1 %v4019_v23  ;;  %2339 = vmatprep.subr.bf16.mxu0 %v4024_v53  ;;  %v4094_v23 = vld [vmem:[#allocation3 + $0x500] ss:$16 sps:$4 sm:$0xff]  }
 0x19a   :  { %2380 = vmatprep.subr.bf16.mxu1 %v4027_v24  ;;  %v4097_v53 = vld [vmem:[#allocation3 + $0x700] ss:$16 sps:$4 sm:$0xff]   ;;  %v4102_v24 = vld [vmem:[#allocation3 + $0xec] ss:$16 sps:$4 sm:$0xff]  }
 0x19c   :  { %2340 = vmatpush1.bf16.msra.mxu0 %v4022_v25  ;;  %v4105_v25 = vld [vmem:[#allocation3 + $0x2ec] ss:$16 sps:$4 sm:$0xff]  }
 0x19d   :  { %2381 = vmatpush1.bf16.msra.mxu1 %v4025_v26  ;;  %2341 = vmatprep.subr.bf16.mxu0 %v4030_v29  ;;  %v4702_v26 = vpack.c.bf16 %v4666_v50, %v4666_v50  ;;  %v4706_v29 = vpack.c.bf16 %v4668_v51, %v4668_v51  ;;  %v4114_v50 = vld [vmem:[#allocation3 + $0xac] ss:$16 sps:$4 sm:$0xff]  }
 0x19e   :  { %2382 = vmatprep.subr.bf16.mxu1 %v4033_v30  ;;  %v4100_v30 = vld [vmem:[#allocation3 + $0xe8] ss:$16 sps:$4 sm:$0xff]   ;;  %v4117_v51 = vld [vmem:[#allocation3 + $0x2ac] ss:$16 sps:$4 sm:$0xff]  }
 0x1a0   :  { %2342 = vmatpush1.bf16.msra.mxu0 %v4028_v31  ;;  %v4103_v31 = vld [vmem:[#allocation3 + $0x2e8] ss:$16 sps:$4 sm:$0xff]  }
 0x1a1   :  { %2383 = vmatpush1.bf16.msra.mxu1 %v4031_v32  ;;  %2343 = vmatprep.subr.bf16.mxu0 %v4036_v33  ;;  %v4108_v32 = vld [vmem:[#allocation3 + $0xcc] ss:$16 sps:$4 sm:$0xff]  }
 0x1a2   :  { %2384 = vmatprep.subr.bf16.mxu1 %v4039_v34  ;;  %v4111_v33 = vld [vmem:[#allocation3 + $0x2cc] ss:$16 sps:$4 sm:$0xff]   ;;  %v4106_v34 = vld [vmem:[#allocation3 + $0xc8] ss:$16 sps:$4 sm:$0xff]  }
 0x1a4   :  { %2344 = vmatpush1.bf16.msra.mxu0 %v4034_v35  ;;  %v4109_v35 = vld [vmem:[#allocation3 + $0x2c8] ss:$16 sps:$4 sm:$0xff]  }
 0x1a5   :  { %2385 = vmatpush1.bf16.msra.mxu1 %v4037_v36  ;;  %2345 = vmatprep.subr.bf16.mxu0 %v4042_v37  ;;  %v4112_v36 = vld [vmem:[#allocation3 + $0xa8] ss:$16 sps:$4 sm:$0xff]  }
 0x1a6   :  { %2386 = vmatprep.subr.bf16.mxu1 %v4045_v38  ;;  %v4115_v37 = vld [vmem:[#allocation3 + $0x2a8] ss:$16 sps:$4 sm:$0xff]   ;;  %v4120_v38 = vld [vmem:[#allocation3 + $0x8c] ss:$16 sps:$4 sm:$0xff]  }
 0x1a8   :  { %2346 = vmatpush1.bf16.msra.mxu0 %v4040_v39  ;;  %v4123_v39 = vld [vmem:[#allocation3 + $0x28c] ss:$16 sps:$4 sm:$0xff]  }
 0x1a9   :  { %2387 = vmatpush1.bf16.msra.mxu1 %v4043_v40  ;;  %2347 = vmatprep.subr.bf16.mxu0 %v4048_v1  ;;  %v4118_v40 = vld [vmem:[#allocation3 + $0x88] ss:$16 sps:$4 sm:$0xff]  }
 0x1aa   :  { %2388 = vmatprep.subr.bf16.mxu1 %v4051_v41  ;;  %v4121_v1 = vld [vmem:[#allocation3 + $0x288] ss:$16 sps:$4 sm:$0xff]   ;;  %v4126_v41 = vld [vmem:[#allocation3 + $0x6c] ss:$16 sps:$4 sm:$0xff]  }
 0x1ac   :  { %2348 = vmatpush1.bf16.msra.mxu0 %v4046_v42  ;;  %v4129_v42 = vld [vmem:[#allocation3 + $0x26c] ss:$16 sps:$4 sm:$0xff]  }
 0x1ad   :  { %2389 = vmatpush1.bf16.msra.mxu1 %v4049_v43  ;;  %2349 = vmatprep.subr.bf16.mxu0 %v4054_v44  ;;  %v4124_v43 = vld [vmem:[#allocation3 + $0x68] ss:$16 sps:$4 sm:$0xff]   ;;  %v4135_v44 = vld [vmem:[#allocation3 + $0x24c] ss:$16 sps:$4 sm:$0xff]  }
 0x1ae   :  { %2390 = vmatprep.subr.bf16.mxu1 %v4057_v45  ;;  %v4130_v45 = vld [vmem:[#allocation3 + $0x48] ss:$16 sps:$4 sm:$0xff]  }
 0x1b0   :  { %2350 = vmatpush2.bf16.msra.mxu0 %v4052_v46  ;;  %v4133_v46 = vld [vmem:[#allocation3 + $0x248] ss:$16 sps:$4 sm:$0xff]  }
 0x1b1   :  { %2391 = vmatpush2.bf16.msra.mxu1 %v4055_v47  ;;  %2351 = vmatprep.subr.bf16.mxu0 %v4060_v48  ;;  %v4138_v47 = vld [vmem:[#allocation3 + $0x2c] ss:$16 sps:$4 sm:$0xff]  }
 0x1b2   :  { %2392 = vmatprep.subr.bf16.mxu1 %v4063_v49  ;;  %v4141_v48 = vld [vmem:[#allocation3 + $0x22c] ss:$16 sps:$4 sm:$0xff]   ;;  %v4136_v49 = vld [vmem:[#allocation3 + $0x28] ss:$16 sps:$4 sm:$0xff]  }
 0x1b4   :  { %2352 = vmatpush2.bf16.msra.mxu0 %v4058_v56  ;;  %v4139_v56 = vld [vmem:[#allocation3 + $0x228] ss:$16 sps:$4 sm:$0xff]  }
 0x1b5   :  { %2393 = vmatpush2.bf16.msra.mxu1 %v4061_v57  ;;  %2353 = vmatprep.subr.bf16.mxu0 %v4066_v58  ;;  %v4144_v57 = vld [vmem:[#allocation3 + $0xc] ss:$16 sps:$4 sm:$0xff]  }
 0x1b6   :  { %2394 = vmatprep.subr.bf16.mxu1 %v4069_v59  ;;  %v4147_v58 = vld [vmem:[#allocation3 + $0x20c] ss:$16 sps:$4 sm:$0xff]   ;;  %v4142_v59 = vld [vmem:[#allocation3 + $0x8] ss:$16 sps:$4 sm:$0xff]  }
 0x1b8   :  { %2354 = vmatpush2.bf16.msra.mxu0 %v4064_v60  ;;  %v4145_v60 = vld [vmem:[#allocation3 + $0x208] ss:$16 sps:$4 sm:$0xff]  }
 0x1b9   :  { %2395 = vmatpush2.bf16.msra.mxu1 %v4067_v61  ;;  %2355 = vmatprep.subr.bf16.mxu0 %v4072_v62  ;;  %v4150_v61 = vld [vmem:[#allocation3 + $0x1ec] ss:$16 sps:$4 sm:$0xff]  }
 0x1ba   :  { %2396 = vmatprep.subr.bf16.mxu1 %v4075_v63  ;;  %v4153_v62 = vld [vmem:[#allocation3 + $0x3ec] ss:$16 sps:$4 sm:$0xff]   ;;  %v4148_v63 = vld [vmem:[#allocation3 + $0x1e8] ss:$16 sps:$4 sm:$0xff]  }
 0x1bc   :  { %2356 = vmatpush2.bf16.msra.mxu0 %v4070_v2  ;;  %v4151_v2 = vld [vmem:[#allocation3 + $0x3e8] ss:$16 sps:$4 sm:$0xff]  }
 0x1bd   :  { %2397 = vmatpush2.bf16.msra.mxu1 %v4073_v3  ;;  %2357 = vmatprep.subr.bf16.mxu0 %v4078_v4  ;;  %v4156_v3 = vld [vmem:[#allocation3 + $0x1cc] ss:$16 sps:$4 sm:$0xff]  }
 0x1be   :  { %2398 = vmatprep.subr.bf16.mxu1 %v4081_v5  ;;  %v4159_v4 = vld [vmem:[#allocation3 + $0x3cc] ss:$16 sps:$4 sm:$0xff]   ;;  %v4154_v5 = vld [vmem:[#allocation3 + $0x1c8] ss:$16 sps:$4 sm:$0xff]  }
 0x1c0   :  { %2358 = vmatpush2.bf16.msra.mxu0 %v4076_v8  ;;  %v4157_v8 = vld [vmem:[#allocation3 + $0x3c8] ss:$16 sps:$4 sm:$0xff]  }
 0x1c1   :  { %2399 = vmatpush2.bf16.msra.mxu1 %v4079_v13  ;;  %2359 = vmatprep.subr.bf16.mxu0 %v4084_v12  ;;  %v4162_v13 = vld [vmem:[#allocation3 + $0x1ac] ss:$16 sps:$4 sm:$0xff]  }
 0x1c2   :  { %2400 = vmatprep.subr.bf16.mxu1 %v4087_v16  ;;  %v4165_v12 = vld [vmem:[#allocation3 + $0x3ac] ss:$16 sps:$4 sm:$0xff]   ;;  %v4160_v16 = vld [vmem:[#allocation3 + $0x1a8] ss:$16 sps:$4 sm:$0xff]  }
 0x1c4   :  { %2360 = vmatpush2.bf16.msra.mxu0 %v4082_v17  ;;  %v4163_v17 = vld [vmem:[#allocation3 + $0x3a8] ss:$16 sps:$4 sm:$0xff]  }
 0x1c5   :  { %2401 = vmatpush2.bf16.msra.mxu1 %v4085_v18  ;;  %2361 = vmatprep.subr.bf16.mxu0 %v4090_v19  ;;  %v4168_v18 = vld [vmem:[#allocation3 + $0x18c] ss:$16 sps:$4 sm:$0xff]  }
 0x1c6   :  { %2402 = vmatprep.subr.bf16.mxu1 %v4093_v28  ;;  %v4171_v19 = vld [vmem:[#allocation3 + $0x38c] ss:$16 sps:$4 sm:$0xff]   ;;  %v4166_v28 = vld [vmem:[#allocation3 + $0x188] ss:$16 sps:$4 sm:$0xff]  }
 0x1c8   :  { %2362 = vmatpush2.bf16.msra.mxu0 %v4088_v21  ;;  %v4169_v21 = vld [vmem:[#allocation3 + $0x388] ss:$16 sps:$4 sm:$0xff]  }
 0x1c9   :  { %2403 = vmatpush2.bf16.msra.mxu1 %v4091_v22  ;;  %2363 = vmatprep.subr.bf16.mxu0 %v4096_v0  ;;  %v4174_v22 = vld [vmem:[#allocation3 + $0x16c] ss:$16 sps:$4 sm:$0xff]  }
 0x1ca   :  { %2404 = vmatprep.subr.bf16.mxu1 %v4099_v52  ;;  %v4177_v0 = vld [vmem:[#allocation3 + $0x36c] ss:$16 sps:$4 sm:$0xff]   ;;  %v4172_v52 = vld [vmem:[#allocation3 + $0x168] ss:$16 sps:$4 sm:$0xff]  }
 0x1cc   :  { %2364 = vmatpush2.bf16.msra.mxu0 %v4094_v23  ;;  %v4175_v23 = vld [vmem:[#allocation3 + $0x368] ss:$16 sps:$4 sm:$0xff]  }
 0x1cd   :  { %2405 = vmatpush2.bf16.msra.mxu1 %v4097_v53  ;;  %2415 = vmatprep.subr.bf16.mxu0 %v4102_v24  ;;  %v4180_v53 = vld [vmem:[#allocation3 + $0x14c] ss:$16 sps:$4 sm:$0xff]  }
 0x1ce   :  { %2456 = vmatprep.subr.bf16.mxu1 %v4105_v25  ;;  %v4183_v24 = vld [vmem:[#allocation3 + $0x34c] ss:$16 sps:$4 sm:$0xff]   ;;  %v4178_v25 = vld [vmem:[#allocation3 + $0x148] ss:$16 sps:$4 sm:$0xff]  }
 0x1cf   :  { %2366 = vmatmul.mubr.bf16.vlgmr.msra.gmra.mxu0 %v4702_v26 }
 0x1d0   :  { %2407 = vmatmul.mubr.bf16.vlgmr.msra.gmra.mxu1 %v4706_v29  ;;  %2416 = vmatpush1.bf16.msra.mxu0 %v4100_v30  ;;  %v4181_v30 = vld [vmem:[#allocation3 + $0x348] ss:$16 sps:$4 sm:$0xff]  }
 0x1d1   :  { %2457 = vmatpush1.bf16.msra.mxu1 %v4103_v31  ;;  %2417 = vmatprep.subr.bf16.mxu0 %v4108_v32  ;;  %v4186_v31 = vld [vmem:[#allocation3 + $0x12c] ss:$16 sps:$4 sm:$0xff]  }
 0x1d2   :  { %2458 = vmatprep.subr.bf16.mxu1 %v4111_v33  ;;  %2447 = vmatprep.mubr.bf16.mxu0 %v4674_v54  ;;  %v4127_v54 = vld [vmem:[#allocation3 + $0x268] ss:$16 sps:$4 sm:$0xff]   ;;  %v4189_v32 = vld [vmem:[#allocation3 + $0x32c] ss:$16 sps:$4 sm:$0xff]  }
 0x1d3   :  { %2488 = vmatprep.mubr.bf16.mxu1 %v4676_v55  ;;  %v4132_v55 = vld [vmem:[#allocation3 + $0x4c] ss:$16 sps:$4 sm:$0xff]   ;;  %v4184_v33 = vld [vmem:[#allocation3 + $0x128] ss:$16 sps:$4 sm:$0xff]  }
 0x1d4   :  { %2418 = vmatpush1.bf16.msra.mxu0 %v4106_v34  ;;  %v4187_v34 = vld [vmem:[#allocation3 + $0x328] ss:$16 sps:$4 sm:$0xff]  }
 0x1d5   :  { %2459 = vmatpush1.bf16.msra.mxu1 %v4109_v35  ;;  %2419 = vmatprep.subr.bf16.mxu0 %v4114_v50  ;;  %v4192_v35 = vld [vmem:[#allocation3 + $0x10c] ss:$16 sps:$4 sm:$0xff]  }
 0x1d6   :  { %2460 = vmatprep.subr.bf16.mxu1 %v4117_v51  ;;  %v4195_v50 = vld [vmem:[#allocation3 + $0x30c] ss:$16 sps:$4 sm:$0xff]   ;;  %v4190_v51 = vld [vmem:[#allocation3 + $0x108] ss:$16 sps:$4 sm:$0xff]  }
 0x1d8   :  { %2420 = vmatpush1.bf16.msra.mxu0 %v4112_v36  ;;  %v4193_v36 = vld [vmem:[#allocation3 + $0x308] ss:$16 sps:$4 sm:$0xff]  }
 0x1d9   :  { %2461 = vmatpush1.bf16.msra.mxu1 %v4115_v37  ;;  %2421 = vmatprep.subr.bf16.mxu0 %v4120_v38  ;;  %v4198_v37 = vld [vmem:[#allocation3 + $0x4ec] ss:$16 sps:$4 sm:$0xff]  }
 0x1da   :  { %2462 = vmatprep.subr.bf16.mxu1 %v4123_v39  ;;  %v4201_v38 = vld [vmem:[#allocation3 + $0x6ec] ss:$16 sps:$4 sm:$0xff]   ;;  %v4196_v39 = vld [vmem:[#allocation3 + $0x4e8] ss:$16 sps:$4 sm:$0xff]  }
 0x1dc   :  { %2422 = vmatpush1.bf16.msra.mxu0 %v4118_v40  ;;  %v4199_v40 = vld [vmem:[#allocation3 + $0x6e8] ss:$16 sps:$4 sm:$0xff]  }
 0x1dd   :  { %2463 = vmatpush1.bf16.msra.mxu1 %v4121_v1  ;;  %2423 = vmatprep.subr.bf16.mxu0 %v4126_v41  ;;  %v4204_v1 = vld [vmem:[#allocation3 + $0x4cc] ss:$16 sps:$4 sm:$0xff]  }
 0x1de   :  { %2464 = vmatprep.subr.bf16.mxu1 %v4129_v42  ;;  %v4207_v41 = vld [vmem:[#allocation3 + $0x6cc] ss:$16 sps:$4 sm:$0xff]   ;;  %v4202_v42 = vld [vmem:[#allocation3 + $0x4c8] ss:$16 sps:$4 sm:$0xff]  }
 0x1e0   :  { %2424 = vmatpush1.bf16.msra.mxu0 %v4124_v43  ;;  %v4205_v43 = vld [vmem:[#allocation3 + $0x6c8] ss:$16 sps:$4 sm:$0xff]  }
 0x1e1   :  { %2465 = vmatpush1.bf16.msra.mxu1 %v4127_v54  ;;  %2425 = vmatprep.subr.bf16.mxu0 %v4132_v55  ;;  %v4210_v54 = vld [vmem:[#allocation3 + $0x4ac] ss:$16 sps:$4 sm:$0xff]  }
 0x1e2   :  { %2466 = vmatprep.subr.bf16.mxu1 %v4135_v44  ;;  %v4213_v55 = vld [vmem:[#allocation3 + $0x6ac] ss:$16 sps:$4 sm:$0xff]   ;;  %v4208_v44 = vld [vmem:[#allocation3 + $0x4a8] ss:$16 sps:$4 sm:$0xff]  }
 0x1e4   :  { %2426 = vmatpush1.bf16.msra.mxu0 %v4130_v45  ;;  %v4211_v45 = vld [vmem:[#allocation3 + $0x6a8] ss:$16 sps:$4 sm:$0xff]  }
 0x1e5   :  { %2467 = vmatpush1.bf16.msra.mxu1 %v4133_v46  ;;  %2427 = vmatprep.subr.bf16.mxu0 %v4138_v47  ;;  %v4214_v46 = vld [vmem:[#allocation3 + $0x488] ss:$16 sps:$4 sm:$0xff]  }
 0x1e6   :  { %2468 = vmatprep.subr.bf16.mxu1 %v4141_v48  ;;  %v4217_v47 = vld [vmem:[#allocation3 + $0x688] ss:$16 sps:$4 sm:$0xff]   ;;  %v4222_v48 = vld [vmem:[#allocation3 + $0x46c] ss:$16 sps:$4 sm:$0xff]  }
 0x1e8   :  { %2428 = vmatpush1.bf16.msra.mxu0 %v4136_v49  ;;  %v4225_v49 = vld [vmem:[#allocation3 + $0x66c] ss:$16 sps:$4 sm:$0xff]  }
 0x1e9   :  { %2469 = vmatpush1.bf16.msra.mxu1 %v4139_v56  ;;  %2429 = vmatprep.subr.bf16.mxu0 %v4144_v57  ;;  %v4228_v56 = vld [vmem:[#allocation3 + $0x44c] ss:$16 sps:$4 sm:$0xff]  }
 0x1ea   :  { %2470 = vmatprep.subr.bf16.mxu1 %v4147_v58  ;;  %v4231_v57 = vld [vmem:[#allocation3 + $0x64c] ss:$16 sps:$4 sm:$0xff]   ;;  %v4226_v58 = vld [vmem:[#allocation3 + $0x448] ss:$16 sps:$4 sm:$0xff]  }
 0x1ec   :  { %2430 = vmatpush1.bf16.msra.mxu0 %v4142_v59  ;;  %v4229_v59 = vld [vmem:[#allocation3 + $0x648] ss:$16 sps:$4 sm:$0xff]  }
 0x1ed   :  { %2471 = vmatpush1.bf16.msra.mxu1 %v4145_v60  ;;  %2431 = vmatprep.subr.bf16.mxu0 %v4150_v61  ;;  %v4234_v60 = vld [vmem:[#allocation3 + $0x42c] ss:$16 sps:$4 sm:$0xff]  }
 0x1ee   :  { %2472 = vmatprep.subr.bf16.mxu1 %v4153_v62  ;;  %v4237_v61 = vld [vmem:[#allocation3 + $0x62c] ss:$16 sps:$4 sm:$0xff]   ;;  %v4232_v62 = vld [vmem:[#allocation3 + $0x428] ss:$16 sps:$4 sm:$0xff]  }
 0x1f0   :  { %2432 = vmatpush2.bf16.msra.mxu0 %v4148_v63  ;;  %v4235_v63 = vld [vmem:[#allocation3 + $0x628] ss:$16 sps:$4 sm:$0xff]  }
 0x1f1   :  { %2473 = vmatpush2.bf16.msra.mxu1 %v4151_v2  ;;  %2433 = vmatprep.subr.bf16.mxu0 %v4156_v3  ;;  %v4240_v2 = vld [vmem:[#allocation3 + $0x40c] ss:$16 sps:$4 sm:$0xff]  }
 0x1f2   :  { %2474 = vmatprep.subr.bf16.mxu1 %v4159_v4  ;;  %v4243_v3 = vld [vmem:[#allocation3 + $0x60c] ss:$16 sps:$4 sm:$0xff]   ;;  %v4238_v4 = vld [vmem:[#allocation3 + $0x408] ss:$16 sps:$4 sm:$0xff]  }
 0x1f4   :  { %2434 = vmatpush2.bf16.msra.mxu0 %v4154_v5  ;;  %v4241_v5 = vld [vmem:[#allocation3 + $0x608] ss:$16 sps:$4 sm:$0xff]  }
 0x1f5   :  { %2475 = vmatpush2.bf16.msra.mxu1 %v4157_v8  ;;  %2435 = vmatprep.subr.bf16.mxu0 %v4162_v13  ;;  %v4246_v8 = vld [vmem:[#allocation3 + $0x5ec] ss:$16 sps:$4 sm:$0xff]  }
 0x1f6   :  { %2476 = vmatprep.subr.bf16.mxu1 %v4165_v12  ;;  %v4249_v13 = vld [vmem:[#allocation3 + $0x7ec] ss:$16 sps:$4 sm:$0xff]   ;;  %v4244_v12 = vld [vmem:[#allocation3 + $0x5e8] ss:$16 sps:$4 sm:$0xff]  }
 0x1f8   :  { %2436 = vmatpush2.bf16.msra.mxu0 %v4160_v16  ;;  %v4247_v16 = vld [vmem:[#allocation3 + $0x7e8] ss:$16 sps:$4 sm:$0xff]  }
 0x1f9   :  { %2477 = vmatpush2.bf16.msra.mxu1 %v4163_v17  ;;  %2437 = vmatprep.subr.bf16.mxu0 %v4168_v18  ;;  %v4252_v17 = vld [vmem:[#allocation3 + $0x5cc] ss:$16 sps:$4 sm:$0xff]  }
 0x1fa   :  { %2478 = vmatprep.subr.bf16.mxu1 %v4171_v19  ;;  %v4255_v18 = vld [vmem:[#allocation3 + $0x7cc] ss:$16 sps:$4 sm:$0xff]   ;;  %v4250_v19 = vld [vmem:[#allocation3 + $0x5c8] ss:$16 sps:$4 sm:$0xff]  }
 0x1fc   :  { %2438 = vmatpush2.bf16.msra.mxu0 %v4166_v28  ;;  %v4253_v28 = vld [vmem:[#allocation3 + $0x7c8] ss:$16 sps:$4 sm:$0xff]  }
 0x1fd   :  { %2479 = vmatpush2.bf16.msra.mxu1 %v4169_v21  ;;  %2439 = vmatprep.subr.bf16.mxu0 %v4174_v22  ;;  %v4258_v21 = vld [vmem:[#allocation3 + $0x5ac] ss:$16 sps:$4 sm:$0xff]  }
 0x1fe   :  { %2480 = vmatprep.subr.bf16.mxu1 %v4177_v0  ;;  %v4261_v22 = vld [vmem:[#allocation3 + $0x7ac] ss:$16 sps:$4 sm:$0xff]   ;;  %v4256_v0 = vld [vmem:[#allocation3 + $0x5a8] ss:$16 sps:$4 sm:$0xff]  }
 0x200   :  { %2440 = vmatpush2.bf16.msra.mxu0 %v4172_v52  ;;  %v4259_v52 = vld [vmem:[#allocation3 + $0x7a8] ss:$16 sps:$4 sm:$0xff]  }
 0x201   :  { %2481 = vmatpush2.bf16.msra.mxu1 %v4175_v23  ;;  %2441 = vmatprep.subr.bf16.mxu0 %v4180_v53  ;;  %v4264_v23 = vld [vmem:[#allocation3 + $0x58c] ss:$16 sps:$4 sm:$0xff]  }
 0x202   :  { %2482 = vmatprep.subr.bf16.mxu1 %v4183_v24  ;;  %v4267_v53 = vld [vmem:[#allocation3 + $0x78c] ss:$16 sps:$4 sm:$0xff]   ;;  %v4262_v24 = vld [vmem:[#allocation3 + $0x588] ss:$16 sps:$4 sm:$0xff]  }
 0x204   :  { %2442 = vmatpush2.bf16.msra.mxu0 %v4178_v25  ;;  %v4265_v25 = vld [vmem:[#allocation3 + $0x788] ss:$16 sps:$4 sm:$0xff]  }
 0x205   :  { %2483 = vmatpush2.bf16.msra.mxu1 %v4181_v30  ;;  %2443 = vmatprep.subr.bf16.mxu0 %v4186_v31  ;;  %v4270_v30 = vld [vmem:[#allocation3 + $0x56c] ss:$16 sps:$4 sm:$0xff]  }
 0x206   :  { %2484 = vmatprep.subr.bf16.mxu1 %v4189_v32  ;;  %v4273_v31 = vld [vmem:[#allocation3 + $0x76c] ss:$16 sps:$4 sm:$0xff]   ;;  %v4268_v32 = vld [vmem:[#allocation3 + $0x568] ss:$16 sps:$4 sm:$0xff]  }
 0x208   :  { %2444 = vmatpush2.bf16.msra.mxu0 %v4184_v33  ;;  %v4271_v33 = vld [vmem:[#allocation3 + $0x768] ss:$16 sps:$4 sm:$0xff]  }
 0x209   :  { %2485 = vmatpush2.bf16.msra.mxu1 %v4187_v34  ;;  %2445 = vmatprep.subr.bf16.mxu0 %v4192_v35  ;;  %v4276_v34 = vld [vmem:[#allocation3 + $0x54c] ss:$16 sps:$4 sm:$0xff]  }
 0x20a   :  { %2486 = vmatprep.subr.bf16.mxu1 %v4195_v50  ;;  %v4279_v35 = vld [vmem:[#allocation3 + $0x74c] ss:$16 sps:$4 sm:$0xff]   ;;  %v4274_v50 = vld [vmem:[#allocation3 + $0x548] ss:$16 sps:$4 sm:$0xff]  }
 0x20c   :  { %2446 = vmatpush2.bf16.msra.mxu0 %v4190_v51  ;;  %v4277_v51 = vld [vmem:[#allocation3 + $0x748] ss:$16 sps:$4 sm:$0xff]  }
 0x20d   :  { %2487 = vmatpush2.bf16.msra.mxu1 %v4193_v36  ;;  %2497 = vmatprep.subr.bf16.mxu0 %v4198_v37  ;;  %v4282_v36 = vld [vmem:[#allocation3 + $0x52c] ss:$16 sps:$4 sm:$0xff]  }
 0x20e   :  { %2538 = vmatprep.subr.bf16.mxu1 %v4201_v38  ;;  %v4285_v37 = vld [vmem:[#allocation3 + $0x72c] ss:$16 sps:$4 sm:$0xff]   ;;  %v4280_v38 = vld [vmem:[#allocation3 + $0x528] ss:$16 sps:$4 sm:$0xff]  }
 0x20f   :  { %2448 = vmatmul.mubr.bf16.vlgmr.msra.gmra.mxu0 %v4682_v14  ;;  %v4216_v14 = vld [vmem:[#allocation3 + $0x48c] ss:$16 sps:$4 sm:$0xff]  }
 0x210   :  { %2489 = vmatmul.mubr.bf16.vlgmr.msra.gmra.mxu1 %v4686_v15  ;;  %2498 = vmatpush1.bf16.msra.mxu0 %v4196_v39  ;;  %v4219_v15 = vld [vmem:[#allocation3 + $0x68c] ss:$16 sps:$4 sm:$0xff]   ;;  %v4283_v39 = vld [vmem:[#allocation3 + $0x728] ss:$16 sps:$4 sm:$0xff]  }
 0x211   :  { %2539 = vmatpush1.bf16.msra.mxu1 %v4199_v40  ;;  %2499 = vmatprep.subr.bf16.mxu0 %v4204_v1  ;;  %v4288_v40 = vld [vmem:[#allocation3 + $0x50c] ss:$16 sps:$4 sm:$0xff]  }
 0x212   :  { %2540 = vmatprep.subr.bf16.mxu1 %v4207_v41  ;;  %2529 = vmatprep.mubr.bf16.mxu0 %v4690_v20  ;;  %v4220_v20 = vld [vmem:[#allocation3 + $0x468] ss:$16 sps:$4 sm:$0xff]   ;;  %v4291_v1 = vld [vmem:[#allocation3 + $0x70c] ss:$16 sps:$4 sm:$0xff]  }
 0x213   :  { %2570 = vmatprep.mubr.bf16.mxu1 %v4694_v27  ;;  %v4223_v27 = vld [vmem:[#allocation3 + $0x668] ss:$16 sps:$4 sm:$0xff]  }
 0x214   :  { %2500 = vmatpush1.bf16.msra.mxu0 %v4202_v42  ;;  %v4286_v41 = vld [vmem:[#allocation3 + $0x508] ss:$16 sps:$4 sm:$0xff]  }
 0x215   :  { %2541 = vmatpush1.bf16.msra.mxu1 %v4205_v43  ;;  %2501 = vmatprep.subr.bf16.mxu0 %v4210_v54  ;;  %v4289_v42 = vld [vmem:[#allocation3 + $0x708] ss:$16 sps:$4 sm:$0xff]  }
 0x216   :  { %2542 = vmatprep.subr.bf16.mxu1 %v4213_v55  ;;  %v941_v43 = vld [vmem:[%s4750_s1 + $0x8] sm:$0xf] }
 0x217   :  { %v954_v54 = vrot.slane %v941_v43, %v4642_v7  ;;  %v958_v55 = vrot.slane %v941_v43, %v4649_v10 }
 0x218   :  { %2502 = vmatpush1.bf16.msra.mxu0 %v4208_v44 }
 0x219   :  { %2543 = vmatpush1.bf16.msra.mxu1 %v4211_v45  ;;  %2503 = vmatprep.subr.bf16.mxu0 %v4216_v14 }
 0x21a   :  { %2544 = vmatprep.subr.bf16.mxu1 %v4219_v15 }
 0x21c   :  { %2504 = vmatpush1.bf16.msra.mxu0 %v4214_v46 }
 0x21d   :  { %2545 = vmatpush1.bf16.msra.mxu1 %v4217_v47  ;;  %2505 = vmatprep.subr.bf16.mxu0 %v4222_v48 }
 0x21e   :  { %2546 = vmatprep.subr.bf16.mxu1 %v4225_v49 }
 0x220   :  { %2506 = vmatpush1.bf16.msra.mxu0 %v4220_v20 }
 0x221   :  { %2547 = vmatpush1.bf16.msra.mxu1 %v4223_v27  ;;  %2507 = vmatprep.subr.bf16.mxu0 %v4228_v56 }
 0x222   :  { %2548 = vmatprep.subr.bf16.mxu1 %v4231_v57 }
 0x224   :  { %2508 = vmatpush1.bf16.msra.mxu0 %v4226_v58 }
 0x225   :  { %2549 = vmatpush1.bf16.msra.mxu1 %v4229_v59  ;;  %2509 = vmatprep.subr.bf16.mxu0 %v4234_v60 }
 0x226   :  { %2550 = vmatprep.subr.bf16.mxu1 %v4237_v61 }
 0x228   :  { %2510 = vmatpush1.bf16.msra.mxu0 %v4232_v62 }
 0x229   :  { %2551 = vmatpush1.bf16.msra.mxu1 %v4235_v63  ;;  %2511 = vmatprep.subr.bf16.mxu0 %v4240_v2 }
 0x22a   :  { %2552 = vmatprep.subr.bf16.mxu1 %v4243_v3 }
 0x22c   :  { %2512 = vmatpush1.bf16.msra.mxu0 %v4238_v4 }
 0x22d   :  { %2553 = vmatpush1.bf16.msra.mxu1 %v4241_v5  ;;  %2513 = vmatprep.subr.bf16.mxu0 %v4246_v8 }
 0x22e   :  { %2554 = vmatprep.subr.bf16.mxu1 %v4249_v13 }
 0x230   :  { %2514 = vmatpush2.bf16.msra.mxu0 %v4244_v12 }
 0x231   :  { %2555 = vmatpush2.bf16.msra.mxu1 %v4247_v16  ;;  %2515 = vmatprep.subr.bf16.mxu0 %v4252_v17 }
 0x232   :  { %2556 = vmatprep.subr.bf16.mxu1 %v4255_v18 }
 0x234   :  { %2516 = vmatpush2.bf16.msra.mxu0 %v4250_v19 }
 0x235   :  { %2557 = vmatpush2.bf16.msra.mxu1 %v4253_v28  ;;  %2517 = vmatprep.subr.bf16.mxu0 %v4258_v21 }
 0x236   :  { %2558 = vmatprep.subr.bf16.mxu1 %v4261_v22 }
 0x238   :  { %2518 = vmatpush2.bf16.msra.mxu0 %v4256_v0  ;;  %v962_v0 = vrot.slane %v941_v43, %v159_v9 }
 0x239   :  { %2559 = vmatpush2.bf16.msra.mxu1 %v4259_v52  ;;  %2519 = vmatprep.subr.bf16.mxu0 %v4264_v23  ;;  %v966_v52 = vrot.slane %v941_v43, %v163_v11 }
 0x23a   :  { %2560 = vmatprep.subr.bf16.mxu1 %v4267_v53 }
 0x23c   :  { %2520 = vmatpush2.bf16.msra.mxu0 %v4262_v24 }
 0x23d   :  { %2561 = vmatpush2.bf16.msra.mxu1 %v4265_v25  ;;  %2521 = vmatprep.subr.bf16.mxu0 %v4270_v30 }
 0x23e   :  { %2562 = vmatprep.subr.bf16.mxu1 %v4273_v31 }
 0x240   :  { %2522 = vmatpush2.bf16.msra.mxu0 %v4268_v32 }
 0x241   :  { %2563 = vmatpush2.bf16.msra.mxu1 %v4271_v33  ;;  %2523 = vmatprep.subr.bf16.mxu0 %v4276_v34 }
 0x242   :  { %2564 = vmatprep.subr.bf16.mxu1 %v4279_v35 }
 0x244   :  { %2524 = vmatpush2.bf16.msra.mxu0 %v4274_v50 }
 0x245   :  { %2565 = vmatpush2.bf16.msra.mxu1 %v4277_v51  ;;  %2525 = vmatprep.subr.bf16.mxu0 %v4282_v36 }
 0x246   :  { %2566 = vmatprep.subr.bf16.mxu1 %v4285_v37 }
 0x248   :  { %2526 = vmatpush2.bf16.msra.mxu0 %v4280_v38 }
 0x249   :  { %2567 = vmatpush2.bf16.msra.mxu1 %v4283_v39  ;;  %2527 = vmatprep.subr.bf16.mxu0 %v4288_v40 }
 0x24a   :  { %2568 = vmatprep.subr.bf16.mxu1 %v4291_v1 }
 0x24c   :  { %2528 = vmatpush2.bf16.msra.mxu0 %v4286_v41 }
 0x24d   :  { %2569 = vmatpush2.bf16.msra.mxu1 %v4289_v42 }
 0x24f   :  { %v2285_v44 = vpop.f32.mrf.mxu0  ;;  %2530 = vmatmul.mubr.bf16.vlgmr.msra.gmra.mxu0 %v4702_v26 }
 0x250   :  { %v2326_v45 = vpop.f32.mrf.mxu1  ;;  %2571 = vmatmul.mubr.bf16.vlgmr.msra.gmra.mxu1 %v4706_v29  ;;  %v2286_v14 = vadd.f32 %v2285_v44, %v954_v54 }
 0x251   :  { %v2287_v15 = vpop.f32.mrf.mxu0 }
 0x252   :  { %v2328_v46 = vpop.f32.mrf.mxu1  ;;  %v2327_v47 = vadd.f32 %v2326_v45, %v2286_v14  ;;  %v2288_v48 = vadd.f32 %v2287_v15, %v958_v55 }
 0x253   :  { %v2289_v49 = vpop.f32.mrf.mxu0 }
 0x254   :  { %v2330_v20 = vpop.f32.mrf.mxu1  ;;  %v2329_v27 = vadd.f32 %v2328_v46, %v2288_v48 }
 0x255   :  { %v2290_v56 = vpop.f32.mrf.mxu0 }
 0x256   :  { %v2331_v57 = vpop.f32.mrf.mxu1 }
 0x28f   :  { %v2367_v58 = vpop.f32.mrf.mxu0 }
 0x290   :  { %v2408_v59 = vpop.f32.mrf.mxu1  ;;  %v2368_v60 = vadd.f32 %v2367_v58, %v2327_v47 }
 0x291   :  { %v2369_v61 = vpop.f32.mrf.mxu0 }
 0x292   :  { %v2410_v62 = vpop.f32.mrf.mxu1  ;;  %v2409_v63 = vadd.f32 %v2408_v59, %v2368_v60  ;;  %v2370_v2 = vadd.f32 %v2369_v61, %v2329_v27 }
 0x293   :  { %v2371_v26 = vpop.f32.mrf.mxu0 }
 0x294   :  { %v2412_v3 = vpop.f32.mrf.mxu1  ;;  %4292 = vtanh.f32 %v2409_v63  ;;  %v2411_v29 = vadd.f32 %v2410_v62, %v2370_v2 }
 0x295   :  { %v2372_v4 = vpop.f32.mrf.mxu0 }
 0x296   :  { %v2413_v5 = vpop.f32.mrf.mxu1  ;;  %4294 = vtanh.f32 %v2411_v29 }
 0x2a1   :  { %v4723_v8 = vpop.eup %4292 }
 0x2a3   :  { %v4295_v13 = vpop.eup %4294 }
 0x2cf   :  { %v2449_v12 = vpop.f32.mrf.mxu0 }
 0x2d0   :  { %v2490_v16 = vpop.f32.mrf.mxu1  ;;  %v2450_v23 = vadd.f32 %v2449_v12, %v962_v0 }
 0x2d1   :  { %v2451_v17 = vpop.f32.mrf.mxu0 }
 0x2d2   :  { %v2492_v18 = vpop.f32.mrf.mxu1  ;;  %v2452_v53 = vadd.f32 %v2451_v17, %v966_v52  ;;  %v2491_v24 = vadd.f32 %v2490_v16, %v2450_v23 }
 0x2d3   :  { %v2453_v19 = vpop.f32.mrf.mxu0 }
 0x2d4   :  { %v2494_v28 = vpop.f32.mrf.mxu1  ;;  %v2493_v31 = vadd.f32 %v2492_v18, %v2452_v53 }
 0x2d5   :  { %v2454_v21 = vpop.f32.mrf.mxu0 }
 0x2d6   :  { %v2495_v22 = vpop.f32.mrf.mxu1 }
 0x30f   :  { %v2531_v25 = vpop.f32.mrf.mxu0 }
 0x310   :  { %v2572_v30 = vpop.f32.mrf.mxu1  ;;  %v2532_v32 = vadd.f32 %v2531_v25, %v2491_v24 }
 0x311   :  { %v2533_v33 = vpop.f32.mrf.mxu0 }
 0x312   :  { %v2574_v34 = vpop.f32.mrf.mxu1  ;;  %v2573_v35 = vadd.f32 %v2572_v30, %v2532_v32  ;;  %v2534_v50 = vadd.f32 %v2533_v33, %v2493_v31 }
 0x313   :  { %v2535_v51 = vpop.f32.mrf.mxu0 }
 0x314   :  { %v2576_v36 = vpop.f32.mrf.mxu1  ;;  %4296 = vtanh.f32 %v2573_v35  ;;  %v2575_v37 = vadd.f32 %v2574_v34, %v2534_v50 }
 0x315   :  { %v2536_v38 = vpop.f32.mrf.mxu0 }
 0x316   :  { %v2577_v9 = vpop.f32.mrf.mxu1  ;;  %4298 = vtanh.f32 %v2575_v37 }
 0x321   :  { %v4729_v6 = vpop.eup %4296 }
 0x323   :  { %v4299_v11 = vpop.eup %4298 }
 0x324   :  { %4550 = dma.done.wait [#allocation7 + $0x2], 8192 }
 0x325   :  { %4551 = vsyncadd [#allocation7 + $0x2], 4294959104  ;;  %v2653_v39 = vpack.c.bf16 %v4295_v13, %v4295_v13  ;;  %v2655_v40 = vpack.c.bf16 %v4299_v11, %v4299_v11  ;;  %v4300_v1 = vld [vmem:[#allocation4 + $0x74] ss:$8 sps:$4 sm:$0xff]   ;;  %v4304_v42 = vld [vmem:[#allocation4 + $0x70] ss:$8 sps:$4 sm:$0xff]  }
 0x326   :  { %v4302_v41 = vld [vmem:[#allocation4 + $0x174] ss:$8 sps:$4 sm:$0xff]   ;;  %2987 = vmatprep.subr.bf16.mxu0 %v4300_v1  ;;  %v4305_v43 = vld [vmem:[#allocation4 + $0x170] ss:$8 sps:$4 sm:$0xff]   ;;  %v4306_v54 = vld [vmem:[#allocation4 + $0x64] ss:$8 sps:$4 sm:$0xff]  }
 0x327   :  { %3019 = vmatprep.mubr.bf16.mxu0 %v2653_v39  ;;  %3060 = vmatprep.mubr.bf16.mxu1 %v2655_v40  ;;  %v4308_v55 = vld [vmem:[#allocation4 + $0x164] ss:$8 sps:$4 sm:$0xff]   ;;  %v4310_v44 = vld [vmem:[#allocation4 + $0x60] ss:$8 sps:$4 sm:$0xff]   ;;  %v4312_v14 = vld [vmem:[#allocation4 + $0x54] ss:$8 sps:$4 sm:$0xff]  }
 0x328   :  { %3028 = vmatprep.subr.bf16.mxu1 %v4302_v41  ;;  %2988 = vmatpush1.bf16.msra.mxu0 %v4304_v42  ;;  %v4311_v45 = vld [vmem:[#allocation4 + $0x160] ss:$8 sps:$4 sm:$0xff]   ;;  %v4314_v15 = vld [vmem:[#allocation4 + $0x154] ss:$8 sps:$4 sm:$0xff]   ;;  %v4316_v46 = vld [vmem:[#allocation4 + $0x50] ss:$8 sps:$4 sm:$0xff]  }
 0x329   :  { %3029 = vmatpush1.bf16.msra.mxu1 %v4305_v43  ;;  %2989 = vmatprep.subr.bf16.mxu0 %v4306_v54  ;;  %v4317_v47 = vld [vmem:[#allocation4 + $0x150] ss:$8 sps:$4 sm:$0xff]   ;;  %v4318_v48 = vld [vmem:[#allocation4 + $0x44] ss:$8 sps:$4 sm:$0xff]   ;;  %v4322_v20 = vld [vmem:[#allocation4 + $0x40] ss:$8 sps:$4 sm:$0xff]   ;;  %v2652_v54 = vpack.c.bf16 %v4723_v8, %v4723_v8 }
 0x32a   :  { %3030 = vmatprep.subr.bf16.mxu1 %v4308_v55  ;;  %v4320_v49 = vld [vmem:[#allocation4 + $0x144] ss:$8 sps:$4 sm:$0xff]   ;;  %v4323_v27 = vld [vmem:[#allocation4 + $0x140] ss:$8 sps:$4 sm:$0xff]   ;;  %v4324_v56 = vld [vmem:[#allocation4 + $0x34] ss:$8 sps:$4 sm:$0xff]   ;;  %v2654_v55 = vpack.c.bf16 %v4729_v6, %v4729_v6 }
 0x32b   :  { %v4326_v57 = vld [vmem:[#allocation4 + $0x134] ss:$8 sps:$4 sm:$0xff]   ;;  %v4328_v58 = vld [vmem:[#allocation4 + $0x30] ss:$8 sps:$4 sm:$0xff]   ;;  %v4330_v60 = vld [vmem:[#allocation4 + $0x24] ss:$8 sps:$4 sm:$0xff]  }
 0x32c   :  { %2990 = vmatpush1.bf16.msra.mxu0 %v4310_v44  ;;  %v4329_v59 = vld [vmem:[#allocation4 + $0x130] ss:$8 sps:$4 sm:$0xff]   ;;  %v4332_v61 = vld [vmem:[#allocation4 + $0x124] ss:$8 sps:$4 sm:$0xff]   ;;  %v4334_v62 = vld [vmem:[#allocation4 + $0x20] ss:$8 sps:$4 sm:$0xff]  }
 0x32d   :  { %3031 = vmatpush1.bf16.msra.mxu1 %v4311_v45  ;;  %2991 = vmatprep.subr.bf16.mxu0 %v4312_v14  ;;  %v4335_v63 = vld [vmem:[#allocation4 + $0x120] ss:$8 sps:$4 sm:$0xff]   ;;  %v4336_v2 = vld [vmem:[#allocation4 + $0x14] ss:$8 sps:$4 sm:$0xff]   ;;  %v4340_v3 = vld [vmem:[#allocation4 + $0x10] ss:$8 sps:$4 sm:$0xff]  }
 0x32e   :  { %3032 = vmatprep.subr.bf16.mxu1 %v4314_v15  ;;  %v4338_v26 = vld [vmem:[#allocation4 + $0x114] ss:$8 sps:$4 sm:$0xff]   ;;  %v4341_v29 = vld [vmem:[#allocation4 + $0x110] ss:$8 sps:$4 sm:$0xff]   ;;  %v4342_v4 = vld [vmem:[#allocation4 + $0x4] ss:$8 sps:$4 sm:$0xff]  }
 0x32f   :  { %v4344_v5 = vld [vmem:[#allocation4 + $0x104] ss:$8 sps:$4 sm:$0xff]   ;;  %v4346_v13 = vld [vmem:[#allocation4] ss:$8 sps:$4 sm:$0xff]   ;;  %v4348_v16 = vld [vmem:[#allocation4 + $0xf4] ss:$8 sps:$4 sm:$0xff]  }
 0x330   :  { %2992 = vmatpush1.bf16.msra.mxu0 %v4316_v46  ;;  %v4347_v12 = vld [vmem:[#allocation4 + $0x100] ss:$8 sps:$4 sm:$0xff]   ;;  %v4350_v17 = vld [vmem:[#allocation4 + $0x1f4] ss:$8 sps:$4 sm:$0xff]   ;;  %v4352_v18 = vld [vmem:[#allocation4 + $0xf0] ss:$8 sps:$4 sm:$0xff]  }
 0x331   :  { %3033 = vmatpush1.bf16.msra.mxu1 %v4317_v47  ;;  %2993 = vmatprep.subr.bf16.mxu0 %v4318_v48  ;;  %v4353_v19 = vld [vmem:[#allocation4 + $0x1f0] ss:$8 sps:$4 sm:$0xff]   ;;  %v4354_v28 = vld [vmem:[#allocation4 + $0xe4] ss:$8 sps:$4 sm:$0xff]   ;;  %v4358_v22 = vld [vmem:[#allocation4 + $0xe0] ss:$8 sps:$4 sm:$0xff]  }
 0x332   :  { %3034 = vmatprep.subr.bf16.mxu1 %v4320_v49  ;;  %v4356_v21 = vld [vmem:[#allocation4 + $0x1e4] ss:$8 sps:$4 sm:$0xff]   ;;  %v4359_v0 = vld [vmem:[#allocation4 + $0x1e0] ss:$8 sps:$4 sm:$0xff]   ;;  %v4360_v52 = vld [vmem:[#allocation4 + $0xd4] ss:$8 sps:$4 sm:$0xff]  }
 0x333   :  { %v4362_v23 = vld [vmem:[#allocation4 + $0x1d4] ss:$8 sps:$4 sm:$0xff]   ;;  %v4364_v53 = vld [vmem:[#allocation4 + $0xd0] ss:$8 sps:$4 sm:$0xff]   ;;  %v4366_v25 = vld [vmem:[#allocation4 + $0xc4] ss:$8 sps:$4 sm:$0xff]  }
 0x334   :  { %2994 = vmatpush1.bf16.msra.mxu0 %v4322_v20  ;;  %v4365_v24 = vld [vmem:[#allocation4 + $0x1d0] ss:$8 sps:$4 sm:$0xff]   ;;  %v4368_v30 = vld [vmem:[#allocation4 + $0x1c4] ss:$8 sps:$4 sm:$0xff]   ;;  %v4370_v31 = vld [vmem:[#allocation4 + $0xc0] ss:$8 sps:$4 sm:$0xff]  }
 0x335   :  { %3035 = vmatpush1.bf16.msra.mxu1 %v4323_v27  ;;  %2995 = vmatprep.subr.bf16.mxu0 %v4324_v56  ;;  %v4371_v32 = vld [vmem:[#allocation4 + $0x1c0] ss:$8 sps:$4 sm:$0xff]   ;;  %v4372_v33 = vld [vmem:[#allocation4 + $0xb4] ss:$8 sps:$4 sm:$0xff]   ;;  %v4376_v35 = vld [vmem:[#allocation4 + $0xb0] ss:$8 sps:$4 sm:$0xff]  }
 0x336   :  { %3036 = vmatprep.subr.bf16.mxu1 %v4326_v57  ;;  %v4374_v34 = vld [vmem:[#allocation4 + $0x1b4] ss:$8 sps:$4 sm:$0xff]   ;;  %v4377_v50 = vld [vmem:[#allocation4 + $0x1b0] ss:$8 sps:$4 sm:$0xff]   ;;  %v4378_v51 = vld [vmem:[#allocation4 + $0xa4] ss:$8 sps:$4 sm:$0xff]  }
 0x337   :  { %v4380_v36 = vld [vmem:[#allocation4 + $0x1a4] ss:$8 sps:$4 sm:$0xff]   ;;  %v4382_v37 = vld [vmem:[#allocation4 + $0xa0] ss:$8 sps:$4 sm:$0xff]   ;;  %v4384_v9 = vld [vmem:[#allocation4 + $0x94] ss:$8 sps:$4 sm:$0xff]  }
 0x338   :  { %2996 = vmatpush1.bf16.msra.mxu0 %v4328_v58  ;;  %v4383_v38 = vld [vmem:[#allocation4 + $0x1a0] ss:$8 sps:$4 sm:$0xff]   ;;  %v4386_v11 = vld [vmem:[#allocation4 + $0x194] ss:$8 sps:$4 sm:$0xff]   ;;  %v4388_v39 = vld [vmem:[#allocation4 + $0x90] ss:$8 sps:$4 sm:$0xff]  }
 0x339   :  { %3037 = vmatpush1.bf16.msra.mxu1 %v4329_v59  ;;  %2997 = vmatprep.subr.bf16.mxu0 %v4330_v60  ;;  %v4389_v40 = vld [vmem:[#allocation4 + $0x190] ss:$8 sps:$4 sm:$0xff]   ;;  %v4390_v1 = vld [vmem:[#allocation4 + $0x84] ss:$8 sps:$4 sm:$0xff]   ;;  %v4394_v42 = vld [vmem:[#allocation4 + $0x80] ss:$8 sps:$4 sm:$0xff]  }
 0x33a   :  { %3038 = vmatprep.subr.bf16.mxu1 %v4332_v61  ;;  %v4392_v41 = vld [vmem:[#allocation4 + $0x184] ss:$8 sps:$4 sm:$0xff]   ;;  %v4395_v43 = vld [vmem:[#allocation4 + $0x180] ss:$8 sps:$4 sm:$0xff]  }
 0x33b   :  { %v2651_v44 = vld [vmem:[%s4750_s1 + $0xc] sm:$0x3] }
 0x33c   :  { %2998 = vmatpush1.bf16.msra.mxu0 %v4334_v62  ;;  %v2660_v45 = vrot.slane %v2651_v44, %v4642_v7  ;;  %v2664_v14 = vrot.slane %v2651_v44, %v4649_v10 }
 0x33d   :  { %3039 = vmatpush1.bf16.msra.mxu1 %v4335_v63  ;;  %2999 = vmatprep.subr.bf16.mxu0 %v4336_v2 }
 0x33e   :  { %3040 = vmatprep.subr.bf16.mxu1 %v4338_v26 }
 0x340   :  { %3000 = vmatpush1.bf16.msra.mxu0 %v4340_v3 }
 0x341   :  { %3041 = vmatpush1.bf16.msra.mxu1 %v4341_v29  ;;  %3001 = vmatprep.subr.bf16.mxu0 %v4342_v4 }
 0x342   :  { %3042 = vmatprep.subr.bf16.mxu1 %v4344_v5 }
 0x344   :  { %3002 = vmatpush1.bf16.msra.mxu0 %v4346_v13 }
 0x345   :  { %3043 = vmatpush1.bf16.msra.mxu1 %v4347_v12  ;;  %3003 = vmatprep.subr.bf16.mxu0 %v4348_v16 }
 0x346   :  { %3044 = vmatprep.subr.bf16.mxu1 %v4350_v17 }
 0x348   :  { %3004 = vmatpush2.bf16.msra.mxu0 %v4352_v18 }
 0x349   :  { %3045 = vmatpush2.bf16.msra.mxu1 %v4353_v19  ;;  %3005 = vmatprep.subr.bf16.mxu0 %v4354_v28 }
 0x34a   :  { %3046 = vmatprep.subr.bf16.mxu1 %v4356_v21 }
 0x34c   :  { %3006 = vmatpush2.bf16.msra.mxu0 %v4358_v22 }
 0x34d   :  { %3047 = vmatpush2.bf16.msra.mxu1 %v4359_v0  ;;  %3007 = vmatprep.subr.bf16.mxu0 %v4360_v52 }
 0x34e   :  { %3048 = vmatprep.subr.bf16.mxu1 %v4362_v23 }
 0x350   :  { %3008 = vmatpush2.bf16.msra.mxu0 %v4364_v53 }
 0x351   :  { %3049 = vmatpush2.bf16.msra.mxu1 %v4365_v24  ;;  %3009 = vmatprep.subr.bf16.mxu0 %v4366_v25 }
 0x352   :  { %3050 = vmatprep.subr.bf16.mxu1 %v4368_v30 }
 0x354   :  { %3010 = vmatpush2.bf16.msra.mxu0 %v4370_v31 }
 0x355   :  { %3051 = vmatpush2.bf16.msra.mxu1 %v4371_v32  ;;  %3011 = vmatprep.subr.bf16.mxu0 %v4372_v33 }
 0x356   :  { %3052 = vmatprep.subr.bf16.mxu1 %v4374_v34 }
 0x358   :  { %3012 = vmatpush2.bf16.msra.mxu0 %v4376_v35 }
 0x359   :  { %3053 = vmatpush2.bf16.msra.mxu1 %v4377_v50  ;;  %3013 = vmatprep.subr.bf16.mxu0 %v4378_v51 }
 0x35a   :  { %3054 = vmatprep.subr.bf16.mxu1 %v4380_v36 }
 0x35c   :  { %3014 = vmatpush2.bf16.msra.mxu0 %v4382_v37 }
 0x35d   :  { %3055 = vmatpush2.bf16.msra.mxu1 %v4383_v38  ;;  %3015 = vmatprep.subr.bf16.mxu0 %v4384_v9 }
 0x35e   :  { %3056 = vmatprep.subr.bf16.mxu1 %v4386_v11 }
 0x360   :  { %3016 = vmatpush2.bf16.msra.mxu0 %v4388_v39 }
 0x361   :  { %3057 = vmatpush2.bf16.msra.mxu1 %v4389_v40  ;;  %3017 = vmatprep.subr.bf16.mxu0 %v4390_v1 }
 0x362   :  { %3058 = vmatprep.subr.bf16.mxu1 %v4392_v41 }
 0x364   :  { %3018 = vmatpush2.bf16.msra.mxu0 %v4394_v42 }
 0x365   :  { %3059 = vmatpush2.bf16.msra.mxu1 %v4395_v43 }
 0x367   :  { %3020 = vmatmul.mubr.bf16.vlgmr.msra.gmra.mxu0 %v2652_v54 }
 0x368   :  { %3061 = vmatmul.mubr.bf16.vlgmr.msra.gmra.mxu1 %v2654_v55 }
 0x427   :  { %v3021_v15 = vpop.f32.mrf.mxu0 }
 0x428   :  { %v3062_v46 = vpop.f32.mrf.mxu1  ;;  %v3022_v47 = vadd.f32 %v3021_v15, %v2660_v45 }
 0x429   :  { %v3023_v48 = vpop.f32.mrf.mxu0 }
 0x42a   :  { %v3064_v8 = vpop.f32.mrf.mxu1  ;;  %v3063_v49 = vadd.f32 %v3062_v46, %v3022_v47  ;;  %v3024_v20 = vadd.f32 %v3023_v48, %v2664_v14 }
 0x42b   :  { %v3025_v6 = vpop.f32.mrf.mxu0 }
 0x42c   :  { %v3066_v27 = vpop.f32.mrf.mxu1  ;;  %4396 = vtanh.f32 %v3063_v49  ;;  %v3065_v56 = vadd.f32 %v3064_v8, %v3024_v20 }
 0x42d   :  { %v3026_v57 = vpop.f32.mrf.mxu0 }
 0x42e   :  { %v3067_v58 = vpop.f32.mrf.mxu1  ;;  %4398 = vtanh.f32 %v3065_v56 }
 0x439   :  { %v4397_v59 = vpop.eup %4396 }
 0x43b   :  { %v4399_v60 = vpop.eup %4398 }
 0x43c   :  { %4552 = dma.done.wait [#allocation7 + $0x3], 2048 }
 0x43d   :  { %4553 = vsyncadd [#allocation7 + $0x3], 4294965248  ;;  %v3109_v7 = vpack.c.bf16 %v4399_v60, %v4399_v60  ;;  %v4400_v10 = vld [vmem:[#allocation5 + $0x78] sm:$0xff]   ;;  %v4402_v62 = vld [vmem:[#allocation5 + $0x70] sm:$0xff]   ;;  %v3108_v28 = vpack.c.bf16 %v4397_v59, %v4397_v59 }
 0x43e   :  { %v4401_v61 = vld [vmem:[#allocation5 + $0x38] sm:$0xff]   ;;  %3832 = vmatprep.subr.bf16.mxu0 %v4400_v10  ;;  %v4403_v63 = vld [vmem:[#allocation5 + $0x30] sm:$0xff]   ;;  %v4404_v2 = vld [vmem:[#allocation5 + $0x68] sm:$0xff]  }
 0x43f   :  { %3244 = vmatprep.mubr.bf16.mxu0 %v3109_v7  ;;  %3833 = vmatpush3.bf16.msra.mxu0 %v4401_v61  ;;  %v4405_v26 = vld [vmem:[#allocation5 + $0x28] sm:$0xff]   ;;  %v4406_v3 = vld [vmem:[#allocation5 + $0x60] sm:$0xff]   ;;  %v4408_v4 = vld [vmem:[#allocation5 + $0x58] sm:$0xff]  }
 0x440   :  { %3834 = vmatprep.subr.bf16.mxu0 %v4402_v62  ;;  %v4407_v29 = vld [vmem:[#allocation5 + $0x20] sm:$0xff]   ;;  %v4409_v5 = vld [vmem:[#allocation5 + $0x18] sm:$0xff]   ;;  %v4410_v13 = vld [vmem:[#allocation5 + $0x50] sm:$0xff]  }
 0x441   :  { %v4411_v12 = vld [vmem:[#allocation5 + $0x10] sm:$0xff]   ;;  %v4412_v16 = vld [vmem:[#allocation5 + $0x48] sm:$0xff]   ;;  %v4414_v18 = vld [vmem:[#allocation5 + $0x40] sm:$0xff]  }
 0x442   :  { %v4413_v17 = vld [vmem:[#allocation5 + $0x8] sm:$0xff]   ;;  %v4415_v19 = vld [vmem:[#allocation5] sm:$0xff]  }
 0x443   :  { %3835 = vmatpush3.bf16.msra.mxu0 %v4403_v63  ;;  %v3801_v22 = vld [vmem:[%s4750_s1 + $0xe] ss:$0 sm:$0xff] }
 0x444   :  { %3836 = vmatprep.subr.bf16.mxu0 %v4404_v2 }
 0x447   :  { %3837 = vmatpush3.bf16.msra.mxu0 %v4405_v26 }
 0x448   :  { %3838 = vmatprep.subr.bf16.mxu0 %v4406_v3 }
 0x44b   :  { %3839 = vmatpush3.bf16.msra.mxu0 %v4407_v29 }
 0x44c   :  { %3840 = vmatprep.subr.bf16.mxu0 %v4408_v4 }
 0x44f   :  { %3841 = vmatpush3.bf16.msra.mxu0 %v4409_v5 }
 0x450   :  { %3842 = vmatprep.subr.bf16.mxu0 %v4410_v13 }
 0x453   :  { %3843 = vmatpush3.bf16.msra.mxu0 %v4411_v12 }
 0x454   :  { %3844 = vmatprep.subr.bf16.mxu0 %v4412_v16 }
 0x457   :  { %3845 = vmatpush3.bf16.msra.mxu0 %v4413_v17 }
 0x458   :  { %3846 = vmatprep.subr.bf16.mxu0 %v4414_v18 }
 0x45b   :  { %3847 = vmatpush3.bf16.msra.mxu0 %v4415_v19 }
 0x45e   :  { %3245 = vmatmul.mubr.bf16.vlgmr.msra.gmra.mxu0 %v3108_v28 }
 0x51e   :  { %v3848_v21 = vpop.f32.mrf.mxu0 }
 0x520   :  { %v3849_v0 = vpop.f32.mrf.mxu0 }
 0x521   :  { %v3850_v52 = vadd.f32 %v3849_v0, %v3848_v21 }
 0x522   :  { %v3851_v23 = vpop.f32.mrf.mxu0 }
 0x523   :  { %v3247_v53 = vadd.f32 %v3850_v52, %v3801_v22 }
 0x524   :  { %v3852_v24 = vpop.f32.mrf.mxu0 }
 0x525   :  { %4416 = vtanh.f32 %v3247_v53 }
 0x532   :  { %v4417_v25 = vpop.eup %4416 }
 0x533   :  { %4554 = dma.done.wait [#allocation7 + $0x4], 1024 }
 0x534   :  { %4555 = vsyncadd [#allocation7 + $0x4], 4294966272  ;;  %v4564_v30 = vmov 0.0   ;;  %vm4565_vm0 = vmmov 0   ;;  %v4418_v31 = vld [vmem:[#allocation6 + $0x38] sm:$0xff]   ;;  %v4419_v32 = vld [vmem:[#allocation6 + $0x30] sm:$0xff]   ;;  %v3273_v37 = vpack.c.bf16 %v4417_v25, %v4417_v25 }
 0x535   :  { %3863 = vmatprep.subr.bf16.mxu1 %v4564_v30  ;;  %3879 = vmatprep.mubr.msk.bf16.mxu1 %vm4565_vm0, %v4564_v30  ;;  %v4420_v33 = vld [vmem:[#allocation6 + $0x28] sm:$0xff]   ;;  %v4421_v34 = vld [vmem:[#allocation6 + $0x20] sm:$0xff]   ;;  %v4422_v35 = vld [vmem:[#allocation6 + $0x18] sm:$0xff]   ;;  %s4566_s9 = smov [#allocation8]  }
 0x536   :  { %3864 = vmatpush3.bf16.msra.mxu1 %v4418_v31  ;;  %v4423_v50 = vld [vmem:[#allocation6 + $0x10] sm:$0xff]   ;;  %v4424_v51 = vld [vmem:[#allocation6 + $0x8] sm:$0xff]   ;;  %v4425_v36 = vld [vmem:[#allocation6] sm:$0xff]   ;;  %s3375_s10 = sshll.u32 %s4566_s9, 4  ;;  %s3376_s10 = int_to_ptr.vmem [resolvable:$true] %s3375_s10 }
 0x537   :  { %3865 = vmatprep.subr.bf16.mxu1 %v4564_v30  ;;  %v3818_v38 = vld [vmem:[%s4750_s1 + $0xf] ss:$0 sm:$0xff]  ;;  %s4526_s0 = scalar_lea.vmem %s3376_s10, 128  ;;  %p4531_p12 = scmp.lt.s32.totalorder %s3376_s10, %s3376_s10 }
 0x538   :  { %p4527_p11 = scmp.ne.s32.totalorder %s3376_s10, %s4526_s0  ;;  %p4532_p13 = scmp.lt.s32.totalorder %s4526_s0, %s4526_s0 }
 0x53a   :  { %3866 = vmatpush3.bf16.msra.mxu1 %v4419_v32  ;;  %p4533_p0 = por %p4532_p13, %p4531_p12 }
 0x53b   :  { %3867 = vmatprep.subr.bf16.mxu1 %v4564_v30 }
 0x53c   :  { %p4534_p1 = pnand %p4533_p0, %p4527_p11 }
 0x53e   :  { %3868 = vmatpush3.bf16.msra.mxu1 %v4420_v33 }
 0x53f   :  { %3869 = vmatprep.subr.bf16.mxu1 %v4564_v30 }
 0x542   :  { %3870 = vmatpush3.bf16.msra.mxu1 %v4421_v34 }
 0x543   :  { %3871 = vmatprep.subr.bf16.mxu1 %v4564_v30 }
 0x546   :  { %3872 = vmatpush3.bf16.msra.mxu1 %v4422_v35 }
 0x547   :  { %3873 = vmatprep.subr.bf16.mxu1 %v4564_v30 }
 0x54a   :  { %3874 = vmatpush3.bf16.msra.mxu1 %v4423_v50 }
 0x54b   :  { %3875 = vmatprep.subr.bf16.mxu1 %v4564_v30 }
 0x54e   :  { %3876 = vmatpush3.bf16.msra.mxu1 %v4424_v51 }
 0x54f   :  { %3877 = vmatprep.subr.bf16.mxu1 %v4564_v30 }
 0x552   :  { %3878 = vmatpush3.bf16.msra.mxu1 %v4425_v36 }
 0x555   :  { %3880 = vmatmul.mubr.bf16.vlgmr.msra.gmra.mxu1 %v3273_v37 }
 0x615   :  { %v3362_v9 = vpop.f32.mrf.mxu1 }
 0x616   :  { %v3363_v11 = vadd.f32 %v3818_v38, %v3362_v9 }
 0x617   :  { %v3881_v39 = vpop.f32.mrf.mxu1 }
 0x618   :  { %3368 = vst [vmem:[#allocation8] sm:$0xff] %v3363_v11 }
 0x619   :  { %v3365_v40 = vpop.f32.mrf.mxu1 }
 0x61a   :  { %4537 = shalt.err (!%p4534_p1)
}
 0x61b   :  { %3378 = dma.vmem_to_hbm [thread:$0]  %s3376_s10, 128, %s4756_s7, [#allocation9]   ;;  %v3882_v1 = vpop.f32.mrf.mxu1 }
 0x61c   :  { %4556 = dma.done.wait [#allocation9], 128  }
 0x61d   :  { %4557 = vsyncadd [#allocation9], 4294967168 }
 0x61e   :  { %3382 = vsyncpa [#allocation9], 1 }
 0x61f   :  { %3383 = vsyncmov [#allocation7] }
 0x622   :  { %s3384_s1 = vpop.sfrf %3383 }
 0x623   :  { %p3827_p2 = scmp.ne.s32.totalorder %s3384_s1, 0 }
 0x625   :  { %3388 = shalt.err (%p3827_p2)  }
 0x626   :  { %3390 = vsyncmov [#allocation7 + $0x1] }
 0x629   :  { %s3391_s13 = vpop.sfrf %3390 }
 0x62a   :  { %p3828_p3 = scmp.ne.s32.totalorder %s3391_s13, 0 }
 0x62c   :  { %3395 = shalt.err (%p3828_p3)  }
 0x62d   :  { %3397 = vsyncmov [#allocation7 + $0x2] }
 0x630   :  { %s3398_s14 = vpop.sfrf %3397 }
 0x631   :  { %p3829_p4 = scmp.ne.s32.totalorder %s3398_s14, 0 }
 0x633   :  { %3402 = shalt.err (%p3829_p4)  }
 0x634   :  { %3404 = vsyncmov [#allocation7 + $0x3] }
 0x637   :  { %s3405_s15 = vpop.sfrf %3404 }
 0x638   :  { %p3830_p5 = scmp.ne.s32.totalorder %s3405_s15, 0 }
 0x63a   :  { %3409 = shalt.err (%p3830_p5)  }
 0x63b   :  { %3411 = vsyncmov [#allocation7 + $0x4] }
 0x63e   :  { %s3412_s7 = vpop.sfrf %3411 }
 0x63f   :  { %p3831_p6 = scmp.ne.s32.totalorder %s3412_s7, 0 }
 0x641   :  { %3416 = shalt.err (%p3831_p6)  }

</bundles_post_ra>
